<compile_context>
chip_gen: v7x
topology: tpu7x:2x2x1
jax: 0.10.0
libtpu: 0.0.40
codegen_flags: <defaults>
</compile_context>

<pallas_src>
import functools

import jax
import jax.numpy as jnp
from jax import lax
from jax.experimental import pallas as pl
from jax.experimental.pallas import tpu as pltpu

EPS = 1e-5                 # PyTorch BatchNorm2d default eps
MM_DTYPE = jnp.bfloat16    # MXU operand dtype (f32 accumulation)


# ------------------------------ Pallas kernel ------------------------------ #

def _fused_kernel(x_ref, e_ref, t0_ref,
                  w1a_ref, w1b_ref, w1c_ref, w1d_ref, t1_ref,
                  w2a_ref, w2b_ref, t2_ref,
                  wt_ref, bt_ref,
                  o_ref, *, mm_dtype):
    """Whole ChessBot forward on one batch tile (all operands VMEM-resident)."""
    # conv0 (1x1, 1->16) + ReLU.  The 16x channel expansion and the conv0 scale
    # are baked into the (64, 1024) matrix E; only bias + ReLU stay on the VPU.
    a0 = jnp.maximum(
        jnp.dot(x_ref[...].astype(mm_dtype), e_ref[...],
                preferred_element_type=jnp.float32) + t0_ref[...], 0.0)       # (TB, 1024)
    a0m = a0.astype(mm_dtype)

    # conv1 (5x5, 16->64): row-grouped Toeplitz matmuls (K=640, N=256 each).
    # BN1 scale folded into the weights; add folded shift + ReLU afterwards.
    h1 = [jnp.dot(a0m[:, oh * 128:oh * 128 + 640], w_ref[...],
                  preferred_element_type=jnp.float32)
          for oh, w_ref in enumerate((w1a_ref, w1b_ref, w1c_ref, w1d_ref))]
    a1 = jnp.maximum(jnp.concatenate(h1, axis=-1) + t1_ref[...], 0.0)         # (TB, 1024)
    a1m = a1.astype(mm_dtype)

    # conv2 (3x3, 64->128): row-grouped Toeplitz matmuls (K=768, N=256 each).
    h2 = [jnp.dot(a1m[:, oh * 256:oh * 256 + 768], w_ref[...],
                  preferred_element_type=jnp.float32)
          for oh, w_ref in enumerate((w2a_ref, w2b_ref))]
    a2 = jnp.maximum(jnp.concatenate(h2, axis=-1) + t2_ref[...], 0.0)         # (TB, 512)

    # Activation-free tail (conv3 -> fc1 -> fc2 -> fc3) pre-folded to one f32
    # vector: a single XLU lane reduction + sigmoid.
    logit = jnp.sum(a2 * wt_ref[...], axis=-1, keepdims=True) + bt_ref[...]   # (TB, 1)
    o_ref[...] = jax.nn.sigmoid(logit).astype(o_ref.dtype)


# ------------------------- Weight / operand preparation --------------------- #

def _round_up(a, b):
    return (a + b - 1) // b * b


def _cdiv(a, b):
    return (a + b - 1) // b


def _conv_to_dense(w_oihw, in_hw, out_hw):
    """PyTorch conv weight (Co,Ci,KH,KW), VALID/stride-1 on a square (in_hw)^2 map,
    as a dense matrix (in_hw*in_hw*Ci, out_hw*out_hw*Co).

    Row order   : (h, w, ci)   -- spatial-major flattening of the input map.
    Column order: (oh, ow, co) -- spatial-major flattening of the output map.
    """
    co, ci, kh, kw = w_oihw.shape
    k = jnp.transpose(w_oihw, (2, 3, 1, 0))                      # (kh, kw, ci, co)
    cols = []
    for oh in range(out_hw):
        for ow in range(out_hw):
            blk = jnp.pad(k, ((oh, in_hw - kh - oh),
                              (ow, in_hw - kw - ow), (0, 0), (0, 0)))
            cols.append(blk.reshape(in_hw * in_hw * ci, co))
    return jnp.concatenate(cols, axis=1)


def _prep_operands(P):
    """Fold all weights into lane-aligned, VMEM-resident matmul operands."""
    f32 = jnp.float32

    # conv0 (1x1, 1->16) as expansion matrix: E[p, p*16 + c] = w0[c].
    w0 = P['conv0_w'].reshape(16).astype(f32)
    e = (jnp.eye(64, dtype=f32)[:, :, None] * w0[None, None, :]).reshape(64, 1024)
    t0 = jnp.tile(P['conv0_b'].astype(f32), 64).reshape(1, 1024)

    # conv1 (5x5, 16->64): dense Toeplitz, BN1 scale folded into columns (f32),
    # then sliced into 4 row groups (640, 256) and cast to bf16.
    s1 = P['bn1_gamma'] / jnp.sqrt(P['bn1_var'] + EPS)
    w1 = _conv_to_dense(P['conv1_w'].astype(f32), 8, 4) * jnp.tile(s1, 16)[None, :]
    t1 = jnp.tile((P['conv1_b'] - P['bn1_mean']) * s1 + P['bn1_beta'], 16)
    t1 = t1.reshape(1, 1024).astype(f32)
    w1g = tuple(w1[oh * 128:oh * 128 + 640, oh * 256:oh * 256 + 256].astype(MM_DTYPE)
                for oh in range(4))

    # conv2 (3x3, 64->128): same treatment, 2 row groups (768, 256).
    s2 = P['bn2_gamma'] / jnp.sqrt(P['bn2_var'] + EPS)
    w2 = _conv_to_dense(P['conv2_w'].astype(f32), 4, 2) * jnp.tile(s2, 4)[None, :]
    t2 = jnp.tile((P['conv2_b'] - P['bn2_mean']) * s2 + P['bn2_beta'], 4)
    t2 = t2.reshape(1, 512).astype(f32)
    w2g = tuple(w2[oh * 256:oh * 256 + 768, oh * 256:oh * 256 + 256].astype(MM_DTYPE)
                for oh in range(2))

    # Activation-free tail conv3 -> fc1 -> fc2 -> fc3 collapsed exactly in f32.
    w3 = _conv_to_dense(P['conv3_w'].astype(f32), 2, 1)                       # (512, 512)
    wt = (w3 @ P['fc1_w'].astype(f32).T @ P['fc2_w'].astype(f32).T
          @ P['fc3_w'].astype(f32).T)                                         # (512, 1)
    bt = ((P['conv3_b'] @ P['fc1_w'].T + P['fc1_b'])
          @ P['fc2_w'].T + P['fc2_b']) @ P['fc3_w'].T + P['fc3_b']
    wt = wt.reshape(1, 512).astype(f32)
    bt = bt.reshape(1, 1).astype(f32)

    return (e.astype(MM_DTYPE), t0, *w1g, t1, *w2g, t2, wt, bt)


# --------------------------------- Forward --------------------------------- #

def chessbot_forward(x_nchw, P, tile_b=None):
    """Fused Pallas forward pass. x_nchw: (B, 1, 8, 8) float32 -> (B, 1) float32."""
    B = x_nchw.shape[0]
    x = x_nchw.reshape(B, 64).astype(jnp.float32)      # (B, 64) -- no 16x expansion in HBM

    # Batch tile: multiple of 8 sublanes, capped at 512, and chosen so the grid
    # has >=2 steps whenever B allows it (keeps both v7x TensorCores busy).
    if tile_b is None:
        tile_b = min(512, _round_up(max(_cdiv(B, 2), 1), 8))
    TB = max(8, _round_up(tile_b, 8))
    Bp = _round_up(B, TB)
    if Bp != B:
        x = jnp.pad(x, ((0, Bp - B), (0, 0)))

    consts = _prep_operands(P)
    operands = (x,) + consts

    def tiled(shape):        # batch-tiled operand
        return pl.BlockSpec((TB,) + shape[1:], lambda i: (i,) + (0,) * (len(shape) - 1))

    def resident(shape):     # grid-invariant operand: DMA'd once, stays in VMEM
        return pl.BlockSpec(shape, lambda i: (0,) * len(shape))

    in_specs = [tiled(x.shape)] + [resident(o.shape) for o in consts]
    n_tiles = Bp // TB

    # VMEM budget from the actual footprint: double-buffered consts + I/O tiles
    # + live per-row intermediates (~32 KiB/row, generous), plus headroom.
    const_bytes = int(sum(o.size * o.dtype.itemsize for o in consts))
    io_tile_bytes = TB * (64 * 4 + 4)
    vmem_limit = 2 * (const_bytes + io_tile_bytes) + TB * 32 * 1024 + (4 << 20)
    vmem_limit = int(min(max(vmem_limit, 16 << 20), 48 << 20))

    # True MACs per padded row (conv0 expansion + row-grouped convs + folded tail).
    macs_per_row = 64 * 1024 + 4 * 640 * 256 + 2 * 768 * 256 + 512
    bytes_accessed = int(const_bytes + Bp * (64 * 4 + 4))

    out = pl.pallas_call(
        functools.partial(_fused_kernel, mm_dtype=MM_DTYPE),
        out_shape=jax.ShapeDtypeStruct((Bp, 1), jnp.float32),
        grid_spec=pltpu.PrefetchScalarGridSpec(
            num_scalar_prefetch=0,
            grid=(n_tiles,),
            in_specs=in_specs,
            out_specs=pl.BlockSpec((TB, 1), lambda i: (i, 0)),
        ),
        compiler_params=pltpu.CompilerParams(
            # TODO(synk): if plain "parallel" does not shard the batch grid over
            # v7x's 2 TensorCores, switch to pltpu.CORE_PARALLEL / pl.core_map.
            dimension_semantics=("parallel",),
            vmem_limit_bytes=vmem_limit,
        ),
        cost_estimate=pl.CostEstimate(
            flops=2 * Bp * macs_per_row,
            transcendentals=Bp,
            bytes_accessed=bytes_accessed),
    )(*operands)
    return out[:B]


# --------------------------- Params & XLA reference ------------------------- #

def init_params(key):
    ks = jax.random.split(key, 22)

    def w(k, shape, scale=0.05):
        return (scale * jax.random.normal(k, shape)).astype(jnp.float32)

    P = {}
    P['conv0_w'] = w(ks[0], (16, 1, 1, 1), 0.1)
    P['conv0_b'] = w(ks[1], (16,), 0.1)
    P['conv1_w'] = w(ks[2], (64, 16, 5, 5))
    P['conv1_b'] = w(ks[3], (64,), 0.1)
    P['conv2_w'] = w(ks[4], (128, 64, 3, 3))
    P['conv2_b'] = w(ks[5], (128,), 0.1)
    P['conv3_w'] = w(ks[6], (512, 128, 2, 2))
    P['conv3_b'] = w(ks[7], (512,), 0.1)
    P['fc1_w'] = w(ks[8], (256, 512))          # PyTorch Linear layout: (out, in)
    P['fc1_b'] = w(ks[9], (256,), 0.1)
    P['fc2_w'] = w(ks[10], (128, 256))
    P['fc2_b'] = w(ks[11], (128,), 0.1)
    P['fc3_w'] = w(ks[12], (1, 128))
    P['fc3_b'] = w(ks[13], (1,), 0.1)
    P['bn1_gamma'] = (1.0 + 0.1 * jax.random.normal(ks[14], (64,))).astype(jnp.float32)
    P['bn1_beta'] = (0.1 * jax.random.normal(ks[15], (64,))).astype(jnp.float32)
    P['bn1_mean'] = (0.05 * jax.random.normal(ks[16], (64,))).astype(jnp.float32)
    P['bn1_var'] = jax.random.uniform(ks[17], (64,), minval=0.5, maxval=1.5).astype(jnp.float32)
    P['bn2_gamma'] = (1.0 + 0.1 * jax.random.normal(ks[18], (128,))).astype(jnp.float32)
    P['bn2_beta'] = (0.1 * jax.random.normal(ks[19], (128,))).astype(jnp.float32)
    P['bn2_mean'] = (0.05 * jax.random.normal(ks[20], (128,))).astype(jnp.float32)
    P['bn2_var'] = jax.random.uniform(ks[21], (128,), minval=0.5, maxval=1.5).astype(jnp.float32)
    return P


def chessbot_reference(x_nchw, P):
    """Pure-JAX (XLA) reference for verification."""
    def conv(x, w, b):
        y = lax.conv_general_dilated(x, w, (1, 1), 'VALID',
                                     dimension_numbers=('NCHW', 'OIHW', 'NCHW'))
        return y + b.reshape(1, -1, 1, 1)

    def bn(x, g, bt, m, v):
        return ((x - m.reshape(1, -1, 1, 1)) / jnp.sqrt(v.reshape(1, -1, 1, 1) + EPS)
                * g.reshape(1, -1, 1, 1) + bt.reshape(1, -1, 1, 1))

    x = jnp.maximum(conv(x_nchw, P['conv0_w'], P['conv0_b']), 0.0)
    x = conv(x, P['conv1_w'], P['conv1_b'])
    x = jnp.maximum(bn(x, P['bn1_gamma'], P['bn1_beta'], P['bn1_mean'], P['bn1_var']), 0.0)
    x = conv(x, P['conv2_w'], P['conv2_b'])
    x = jnp.maximum(bn(x, P['bn2_gamma'], P['bn2_beta'], P['bn2_mean'], P['bn2_var']), 0.0)
    x = conv(x, P['conv3_w'], P['conv3_b'])
    x = x.reshape(x.shape[0], -1)
    x = x @ P['fc1_w'].T + P['fc1_b']
    x = x @ P['fc2_w'].T + P['fc2_b']
    x = x @ P['fc3_w'].T + P['fc3_b']
    return jax.nn.sigmoid(x)


if __name__ == "__main__":
    key = jax.random.PRNGKey(0)
    pkey, xkey, x2key = jax.random.split(key, 3)
    params = init_params(pkey)

    fwd = jax.jit(chessbot_forward, static_argnames=("tile_b",))

    # The fc1 in_features=512 implies an 8x8 single-channel board input.
    x = jax.random.normal(xkey, (2, 1, 8, 8), dtype=jnp.float32)
    out = jax.block_until_ready(fwd(x, params))
    ref = jax.block_until_ready(chessbot_reference(x, params))
    assert out.shape == (2, 1), out.shape
    err = float(jnp.max(jnp.abs(out - ref)))
    assert err < 1e-2, (err, out, ref)

    # Exercise multi-step batch grid + batch padding (B=13 with a tile of 8).
    x2 = jax.random.normal(x2key, (13, 1, 8, 8), dtype=jnp.float32)
    out2 = jax.block_until_ready(fwd(x2, params, tile_b=8))
    ref2 = jax.block_until_ready(chessbot_reference(x2, params))
    assert out2.shape == (13, 1), out2.shape
    err2 = float(jnp.max(jnp.abs(out2 - ref2)))
    assert err2 < 1e-2, (err2,)

    print("KERNEL_OK")
</pallas_src>

<mosaic_0001>
module attributes {stable_mosaic.version = 11 : i64} {
  func.func @_fused_kernel(%arg0: i32, %arg1: memref<8x64xf32, #tpu.memory_space<vmem>>, %arg2: memref<64x1024xbf16, #tpu.memory_space<vmem>>, %arg3: memref<1x1024xf32, #tpu.memory_space<vmem>>, %arg4: memref<640x256xbf16, #tpu.memory_space<vmem>>, %arg5: memref<640x256xbf16, #tpu.memory_space<vmem>>, %arg6: memref<640x256xbf16, #tpu.memory_space<vmem>>, %arg7: memref<640x256xbf16, #tpu.memory_space<vmem>>, %arg8: memref<1x1024xf32, #tpu.memory_space<vmem>>, %arg9: memref<768x256xbf16, #tpu.memory_space<vmem>>, %arg10: memref<768x256xbf16, #tpu.memory_space<vmem>>, %arg11: memref<1x512xf32, #tpu.memory_space<vmem>>, %arg12: memref<1x512xf32, #tpu.memory_space<vmem>>, %arg13: memref<1x1xf32, #tpu.memory_space<vmem>>, %arg14: memref<8x1xf32, #tpu.memory_space<vmem>>) attributes {dimension_semantics = [#tpu.dimension_semantics<parallel>], iteration_bounds = array<i64: 1>, scalar_prefetch = 0 : i64, scratch_operands = 0 : i64, tpu.core_type = #tpu.core_type<tc>, window_params = [{transform_indices = @transform_0, window_bounds = array<i64: 8, 64>}, {pipeline_mode = #tpu.pipeline_mode<synchronous>, transform_indices = @transform_1, window_bounds = array<i64: 64, 1024>}, {pipeline_mode = #tpu.pipeline_mode<synchronous>, transform_indices = @transform_2, window_bounds = array<i64: 1, 1024>}, {pipeline_mode = #tpu.pipeline_mode<synchronous>, transform_indices = @transform_3, window_bounds = array<i64: 640, 256>}, {pipeline_mode = #tpu.pipeline_mode<synchronous>, transform_indices = @transform_4, window_bounds = array<i64: 640, 256>}, {pipeline_mode = #tpu.pipeline_mode<synchronous>, transform_indices = @transform_5, window_bounds = array<i64: 640, 256>}, {pipeline_mode = #tpu.pipeline_mode<synchronous>, transform_indices = @transform_6, window_bounds = array<i64: 640, 256>}, {pipeline_mode = #tpu.pipeline_mode<synchronous>, transform_indices = @transform_7, window_bounds = array<i64: 1, 1024>}, {pipeline_mode = #tpu.pipeline_mode<synchronous>, transform_indices = @transform_8, window_bounds = array<i64: 768, 256>}, {pipeline_mode = #tpu.pipeline_mode<synchronous>, transform_indices = @transform_9, window_bounds = array<i64: 768, 256>}, {pipeline_mode = #tpu.pipeline_mode<synchronous>, transform_indices = @transform_10, window_bounds = array<i64: 1, 512>}, {pipeline_mode = #tpu.pipeline_mode<synchronous>, transform_indices = @transform_11, window_bounds = array<i64: 1, 512>}, {pipeline_mode = #tpu.pipeline_mode<synchronous>, transform_indices = @transform_12, window_bounds = array<i64: 1, 1>}, {transform_indices = @transform_13, window_bounds = array<i64: 8, 1>}]} {
    %c0 = arith.constant 0 : index
    %c0_0 = arith.constant 0 : index
    %0 = vector.load %arg1[%c0, %c0_0] : memref<8x64xf32, #tpu.memory_space<vmem>>, vector<8x64xf32>
    %1 = arith.truncf %0 : vector<8x64xf32> to vector<8x64xbf16>
    %c0_1 = arith.constant 0 : index
    %c0_2 = arith.constant 0 : index
    %2 = vector.load %arg2[%c0_1, %c0_2] : memref<64x1024xbf16, #tpu.memory_space<vmem>>, vector<64x1024xbf16>
    %cst = arith.constant dense<0.000000e+00> : vector<8x1024xf32>
    %3 = tpu.matmul %1, %2, %cst {dimension_numbers = #tpu.dot_dimension_numbers<[1], [0], [0], [1], [0, 0, 1, 1], [], []>} : vector<8x64xbf16>, vector<64x1024xbf16>, vector<8x1024xf32> -> vector<8x1024xf32>
    %c0_3 = arith.constant 0 : index
    %c0_4 = arith.constant 0 : index
    %4 = vector.load %arg3[%c0_3, %c0_4] : memref<1x1024xf32, #tpu.memory_space<vmem>>, vector<1x1024xf32>
    %5 = vector.broadcast %4 : vector<1x1024xf32> to vector<8x1024xf32>
    %6 = arith.addf %3, %5 : vector<8x1024xf32>
    %cst_5 = arith.constant 0.000000e+00 : f32
    %7 = vector.broadcast %cst_5 : f32 to vector<8x1024xf32>
    %8 = arith.maximumf %6, %7 : vector<8x1024xf32>
    %9 = arith.truncf %8 : vector<8x1024xf32> to vector<8x1024xbf16>
    %10 = vector.extract_strided_slice %9 {offsets = [0, 0], sizes = [8, 640], strides = [1, 1]} : vector<8x1024xbf16> to vector<8x640xbf16>
    %c0_6 = arith.constant 0 : index
    %c0_7 = arith.constant 0 : index
    %11 = vector.load %arg4[%c0_6, %c0_7] : memref<640x256xbf16, #tpu.memory_space<vmem>>, vector<640x256xbf16>
    %cst_8 = arith.constant dense<0.000000e+00> : vector<8x256xf32>
    %12 = tpu.matmul %10, %11, %cst_8 {dimension_numbers = #tpu.dot_dimension_numbers<[1], [0], [0], [1], [0, 0, 1, 1], [], []>} : vector<8x640xbf16>, vector<640x256xbf16>, vector<8x256xf32> -> vector<8x256xf32>
    %13 = vector.extract_strided_slice %9 {offsets = [0, 128], sizes = [8, 640], strides = [1, 1]} : vector<8x1024xbf16> to vector<8x640xbf16>
    %c0_9 = arith.constant 0 : index
    %c0_10 = arith.constant 0 : index
    %14 = vector.load %arg5[%c0_9, %c0_10] : memref<640x256xbf16, #tpu.memory_space<vmem>>, vector<640x256xbf16>
    %cst_11 = arith.constant dense<0.000000e+00> : vector<8x256xf32>
    %15 = tpu.matmul %13, %14, %cst_11 {dimension_numbers = #tpu.dot_dimension_numbers<[1], [0], [0], [1], [0, 0, 1, 1], [], []>} : vector<8x640xbf16>, vector<640x256xbf16>, vector<8x256xf32> -> vector<8x256xf32>
    %16 = vector.extract_strided_slice %9 {offsets = [0, 256], sizes = [8, 640], strides = [1, 1]} : vector<8x1024xbf16> to vector<8x640xbf16>
    %c0_12 = arith.constant 0 : index
    %c0_13 = arith.constant 0 : index
    %17 = vector.load %arg6[%c0_12, %c0_13] : memref<640x256xbf16, #tpu.memory_space<vmem>>, vector<640x256xbf16>
    %cst_14 = arith.constant dense<0.000000e+00> : vector<8x256xf32>
    %18 = tpu.matmul %16, %17, %cst_14 {dimension_numbers = #tpu.dot_dimension_numbers<[1], [0], [0], [1], [0, 0, 1, 1], [], []>} : vector<8x640xbf16>, vector<640x256xbf16>, vector<8x256xf32> -> vector<8x256xf32>
    %19 = vector.extract_strided_slice %9 {offsets = [0, 384], sizes = [8, 640], strides = [1, 1]} : vector<8x1024xbf16> to vector<8x640xbf16>
    %c0_15 = arith.constant 0 : index
    %c0_16 = arith.constant 0 : index
    %20 = vector.load %arg7[%c0_15, %c0_16] : memref<640x256xbf16, #tpu.memory_space<vmem>>, vector<640x256xbf16>
    %cst_17 = arith.constant dense<0.000000e+00> : vector<8x256xf32>
    %21 = tpu.matmul %19, %20, %cst_17 {dimension_numbers = #tpu.dot_dimension_numbers<[1], [0], [0], [1], [0, 0, 1, 1], [], []>} : vector<8x640xbf16>, vector<640x256xbf16>, vector<8x256xf32> -> vector<8x256xf32>
    %22 = tpu.concatenate %12, %15, %18, %21 in 1 : vector<8x256xf32>, vector<8x256xf32>, vector<8x256xf32>, vector<8x256xf32> -> vector<8x1024xf32>
    %c0_18 = arith.constant 0 : index
    %c0_19 = arith.constant 0 : index
    %23 = vector.load %arg8[%c0_18, %c0_19] : memref<1x1024xf32, #tpu.memory_space<vmem>>, vector<1x1024xf32>
    %24 = vector.broadcast %23 : vector<1x1024xf32> to vector<8x1024xf32>
    %25 = arith.addf %22, %24 : vector<8x1024xf32>
    %cst_20 = arith.constant 0.000000e+00 : f32
    %26 = vector.broadcast %cst_20 : f32 to vector<8x1024xf32>
    %27 = arith.maximumf %25, %26 : vector<8x1024xf32>
    %28 = arith.truncf %27 : vector<8x1024xf32> to vector<8x1024xbf16>
    %29 = vector.extract_strided_slice %28 {offsets = [0, 0], sizes = [8, 768], strides = [1, 1]} : vector<8x1024xbf16> to vector<8x768xbf16>
    %c0_21 = arith.constant 0 : index
    %c0_22 = arith.constant 0 : index
    %30 = vector.load %arg9[%c0_21, %c0_22] : memref<768x256xbf16, #tpu.memory_space<vmem>>, vector<768x256xbf16>
    %cst_23 = arith.constant dense<0.000000e+00> : vector<8x256xf32>
    %31 = tpu.matmul %29, %30, %cst_23 {dimension_numbers = #tpu.dot_dimension_numbers<[1], [0], [0], [1], [0, 0, 1, 1], [], []>} : vector<8x768xbf16>, vector<768x256xbf16>, vector<8x256xf32> -> vector<8x256xf32>
    %32 = vector.extract_strided_slice %28 {offsets = [0, 256], sizes = [8, 768], strides = [1, 1]} : vector<8x1024xbf16> to vector<8x768xbf16>
    %c0_24 = arith.constant 0 : index
    %c0_25 = arith.constant 0 : index
    %33 = vector.load %arg10[%c0_24, %c0_25] : memref<768x256xbf16, #tpu.memory_space<vmem>>, vector<768x256xbf16>
    %cst_26 = arith.constant dense<0.000000e+00> : vector<8x256xf32>
    %34 = tpu.matmul %32, %33, %cst_26 {dimension_numbers = #tpu.dot_dimension_numbers<[1], [0], [0], [1], [0, 0, 1, 1], [], []>} : vector<8x768xbf16>, vector<768x256xbf16>, vector<8x256xf32> -> vector<8x256xf32>
    %35 = tpu.concatenate %31, %34 in 1 : vector<8x256xf32>, vector<8x256xf32> -> vector<8x512xf32>
    %c0_27 = arith.constant 0 : index
    %c0_28 = arith.constant 0 : index
    %36 = vector.load %arg11[%c0_27, %c0_28] : memref<1x512xf32, #tpu.memory_space<vmem>>, vector<1x512xf32>
    %37 = vector.broadcast %36 : vector<1x512xf32> to vector<8x512xf32>
    %38 = arith.addf %35, %37 : vector<8x512xf32>
    %cst_29 = arith.constant 0.000000e+00 : f32
    %39 = vector.broadcast %cst_29 : f32 to vector<8x512xf32>
    %40 = arith.maximumf %38, %39 : vector<8x512xf32>
    %c0_30 = arith.constant 0 : index
    %c0_31 = arith.constant 0 : index
    %41 = vector.load %arg12[%c0_30, %c0_31] : memref<1x512xf32, #tpu.memory_space<vmem>>, vector<1x512xf32>
    %42 = vector.broadcast %41 : vector<1x512xf32> to vector<8x512xf32>
    %43 = arith.mulf %40, %42 : vector<8x512xf32>
    %cst_32 = arith.constant dense<0.000000e+00> : vector<8xf32>
    %44 = vector.multi_reduction <add>, %43, %cst_32 [1] : vector<8x512xf32> to vector<8xf32>
    %45 = vector.shape_cast %44 : vector<8xf32> to vector<8x1xf32>
    %c0_33 = arith.constant 0 : index
    %c0_34 = arith.constant 0 : index
    %46 = vector.load %arg13[%c0_33, %c0_34] : memref<1x1xf32, #tpu.memory_space<vmem>>, vector<1x1xf32>
    %47 = vector.broadcast %46 : vector<1x1xf32> to vector<8x1xf32>
    %48 = arith.addf %45, %47 : vector<8x1xf32>
    %49 = arith.negf %48 : vector<8x1xf32>
    %50 = math.exp %49 : vector<8x1xf32>
    %cst_35 = arith.constant 1.000000e+00 : f32
    %51 = vector.broadcast %cst_35 : f32 to vector<8x1xf32>
    %52 = arith.addf %51, %50 : vector<8x1xf32>
    %53 = arith.divf %51, %52 : vector<8x1xf32>
    %c0_36 = arith.constant 0 : index
    %c0_37 = arith.constant 0 : index
    %54 = vector.load %arg14[%c0_36, %c0_37] : memref<8x1xf32, #tpu.memory_space<vmem>>, vector<8x1xf32>
    tpu.vector_store %arg14[%c0_36, %c0_37], %53 {strides = array<i32>} : memref<8x1xf32, #tpu.memory_space<vmem>>, vector<8x1xf32>,
    return
  }
  func.func @transform_0(%arg0: i32) -> (i32, i32) {
    %c0_i32 = arith.constant 0 : i32
    %c0_i32_0 = arith.constant 0 : i32
    return %arg0, %c0_i32 : i32, i32
  }
  func.func @transform_1(%arg0: i32) -> (i32, i32) {
    %c0_i32 = arith.constant 0 : i32
    %c0_i32_0 = arith.constant 0 : i32
    %c0_i32_1 = arith.constant 0 : i32
    return %c0_i32, %c0_i32_0 : i32, i32
  }
  func.func @transform_2(%arg0: i32) -> (i32, i32) {
    %c0_i32 = arith.constant 0 : i32
    %c0_i32_0 = arith.constant 0 : i32
    %c0_i32_1 = arith.constant 0 : i32
    return %c0_i32, %c0_i32_0 : i32, i32
  }
  func.func @transform_3(%arg0: i32) -> (i32, i32) {
    %c0_i32 = arith.constant 0 : i32
    %c0_i32_0 = arith.constant 0 : i32
    %c0_i32_1 = arith.constant 0 : i32
    return %c0_i32, %c0_i32_0 : i32, i32
  }
  func.func @transform_4(%arg0: i32) -> (i32, i32) {
    %c0_i32 = arith.constant 0 : i32
    %c0_i32_0 = arith.constant 0 : i32
    %c0_i32_1 = arith.constant 0 : i32
    return %c0_i32, %c0_i32_0 : i32, i32
  }
  func.func @transform_5(%arg0: i32) -> (i32, i32) {
    %c0_i32 = arith.constant 0 : i32
    %c0_i32_0 = arith.constant 0 : i32
    %c0_i32_1 = arith.constant 0 : i32
    return %c0_i32, %c0_i32_0 : i32, i32
  }
  func.func @transform_6(%arg0: i32) -> (i32, i32) {
    %c0_i32 = arith.constant 0 : i32
    %c0_i32_0 = arith.constant 0 : i32
    %c0_i32_1 = arith.constant 0 : i32
    return %c0_i32, %c0_i32_0 : i32, i32
  }
  func.func @transform_7(%arg0: i32) -> (i32, i32) {
    %c0_i32 = arith.constant 0 : i32
    %c0_i32_0 = arith.constant 0 : i32
    %c0_i32_1 = arith.constant 0 : i32
    return %c0_i32, %c0_i32_0 : i32, i32
  }
  func.func @transform_8(%arg0: i32) -> (i32, i32) {
    %c0_i32 = arith.constant 0 : i32
    %c0_i32_0 = arith.constant 0 : i32
    %c0_i32_1 = arith.constant 0 : i32
    return %c0_i32, %c0_i32_0 : i32, i32
  }
  func.func @transform_9(%arg0: i32) -> (i32, i32) {
    %c0_i32 = arith.constant 0 : i32
    %c0_i32_0 = arith.constant 0 : i32
    %c0_i32_1 = arith.constant 0 : i32
    return %c0_i32, %c0_i32_0 : i32, i32
  }
  func.func @transform_10(%arg0: i32) -> (i32, i32) {
    %c0_i32 = arith.constant 0 : i32
    %c0_i32_0 = arith.constant 0 : i32
    %c0_i32_1 = arith.constant 0 : i32
    return %c0_i32, %c0_i32_0 : i32, i32
  }
  func.func @transform_11(%arg0: i32) -> (i32, i32) {
    %c0_i32 = arith.constant 0 : i32
    %c0_i32_0 = arith.constant 0 : i32
    %c0_i32_1 = arith.constant 0 : i32
    return %c0_i32, %c0_i32_0 : i32, i32
  }
  func.func @transform_12(%arg0: i32) -> (i32, i32) {
    %c0_i32 = arith.constant 0 : i32
    %c0_i32_0 = arith.constant 0 : i32
    %c0_i32_1 = arith.constant 0 : i32
    return %c0_i32, %c0_i32_0 : i32, i32
  }
  func.func @transform_13(%arg0: i32) -> (i32, i32) {
    %c0_i32 = arith.constant 0 : i32
    %c0_i32_0 = arith.constant 0 : i32
    return %arg0, %c0_i32 : i32, i32
  }
}

</mosaic_0001>

<bundles_post_ra>
// kernel: tile.33
= control target key start
LH: loop header
LB: loop body
LE: loop exit
PB: predicated region body
PF: predicated region fallthrough
CT: control target
= control target key end

     0   :  { %s28_s0 = inlined_call_operand.vmem [shape: f32[64], index: 0, kind: input, shape index: {}]   ;;  %s29_s1 = inlined_call_operand.vmem [shape: f32[16,64], index: 1, kind: output, shape index: {}]  }
   0x1   :  { %v4_v0 = vld [vmem:[%s28_s0] ss:$0 sm:$0xff] }
   0x2   :  { %5 = vst [vmem:[%s29_s1] sm:$0xff] %v4_v0  ;;  %8 = vst [vmem:[%s29_s1 + $0x8] sm:$0xff] %v4_v0 }

// kernel: mul.25
= control target key start
LH: loop header
LB: loop body
LE: loop exit
PB: predicated region body
PF: predicated region fallthrough
CT: control target
= control target key end

     0   :  { %vm3_vm0 = vcmask 523264   ;;  %s13_s11 = smov 64   ;;  %vm9_vm1 = vcmask 1048064   ;;  %s36_s0 = inlined_call_operand.vmem [shape: f32[16,64], index: 0, kind: input, shape index: {}]   ;;  %s37_s1 = inlined_call_operand.vmem [shape: f32[1024], index: 1, kind: output, shape index: {}]  }
   0x1   :  { %v2_v0 = vld [vmem:[%s36_s0] ss:$2 sm:$0xff]   ;;  %v11_v1 = vld [vmem:[%s36_s0 + $0x1] ss:$2 sm:$0xff]  }
   0x2   :  { %4 = vst.msk [vmem:[%s37_s1] sm:$0xff] %vm3_vm0, %v2_v0   ;;  %7 = vrot.lane.b32.xlu0 %v11_v1, %s13_s11 }
  0x74   :  { %v8_v2 = vpop.permute.xlu0 %7  }
  0x75   :  { %10 = vst.msk [vmem:[%s37_s1] sm:$0xff] %vm9_vm1, %v8_v2  }

// kernel: tile.39
= control target key start
LH: loop header
LB: loop body
LE: loop exit
PB: predicated region body
PF: predicated region fallthrough
CT: control target
= control target key end

     0   :  { %vm3_vm0 = vcmask 523264   ;;  %vm10_vm1 = vcmask 1048064   ;;  %s116_s0 = inlined_call_operand.vmem [shape: f32[16,64], index: 0, kind: input, shape index: {}]   ;;  %s117_s1 = inlined_call_operand.vmem [shape: f32[1,1024], index: 1, kind: output, shape index: {}]  }
   0x1   :  { %v66_v0 = vld [vmem:[%s116_s0 + $0x1] ss:$2 sm:$0xff]   ;;  %v2_v1 = vld [vmem:[%s116_s0] ss:$2 sm:$0xff]   ;;  %s75_s0 = smov 64  }
   0x2   :  { %8 = vrot.lane.b32.xlu0 %v66_v0, %s75_s0  ;;  %4 = vst.msk [vmem:[#allocation0] ss:$8 sm:$0xf] %vm3_vm0, %v2_v1   ;;  %5 = vst.msk [vmem:[#allocation0] ss:$8 sm:$0xf0] %vm3_vm0, %v2_v1  }
  0x74   :  { %v9_v2 = vpop.permute.xlu0 %8  }
  0x75   :  { %11 = vst.msk [vmem:[#allocation0] ss:$8 sm:$0xf] %vm10_vm1, %v9_v2   ;;  %12 = vst.msk [vmem:[#allocation0] ss:$8 sm:$0xf0] %vm10_vm1, %v9_v2  }
  0x7c   :  { %v16_v3 = vld [vmem:[#allocation0] sm:$0x1]  ;;  %v20_v4 = vld [vmem:[#allocation0 + $0x8] sm:$0x1]  ;;  %v25_v5 = vld [vmem:[#allocation0 + $0x10] sm:$0x1] }
  0x7d   :  { %18 = vst [vmem:[%s117_s1] sm:$0x1] %v16_v3  ;;  %67 = vst [vmem:[%s117_s1 + $0x1] sm:$0x1] %v20_v4  ;;  %v31_v6 = vld [vmem:[#allocation0 + $0x18] sm:$0x1] }
  0x7e   :  { %68 = vst [vmem:[%s117_s1 + $0x2] sm:$0x1] %v25_v5  ;;  %v37_v7 = vld [vmem:[#allocation0 + $0x20] sm:$0x1]  ;;  %v43_v8 = vld [vmem:[#allocation0 + $0x28] sm:$0x1] }
  0x7f   :  { %69 = vst [vmem:[%s117_s1 + $0x3] sm:$0x1] %v31_v6  ;;  %70 = vst [vmem:[%s117_s1 + $0x4] sm:$0x1] %v37_v7  ;;  %v49_v9 = vld [vmem:[#allocation0 + $0x30] sm:$0x1] }
  0x80   :  { %71 = vst [vmem:[%s117_s1 + $0x5] sm:$0x1] %v43_v8  ;;  %v55_v10 = vld [vmem:[#allocation0 + $0x38] sm:$0x1]  ;;  %72 = vst [vmem:[%s117_s1 + $0x6] sm:$0x1] %v49_v9 }
  0x81   :  { %73 = vst [vmem:[%s117_s1 + $0x7] sm:$0x1] %v55_v10 }

// kernel: tile.48
= control target key start
LH: loop header
LB: loop body
LE: loop exit
PB: predicated region body
PF: predicated region fallthrough
CT: control target
= control target key end

     0   :  { %s22_s0 = inlined_call_operand.vmem [shape: f32[128], index: 0, kind: input, shape index: {}]   ;;  %s23_s1 = inlined_call_operand.vmem [shape: f32[4,128], index: 1, kind: output, shape index: {}]  }
   0x1   :  { %v4_v0 = vld [vmem:[%s22_s0] ss:$0 sm:$0xff] }
   0x2   :  { %5 = vst [vmem:[%s23_s1] sm:$0xf] %v4_v0 }

// kernel: tile.29
= control target key start
LH: loop header
LB: loop body
LE: loop exit
PB: predicated region body
PF: predicated region fallthrough
CT: control target
= control target key end

     0   :  { %vm4_vm0 = vcmask 1047556   ;;  %s167_s16 = smov 112   ;;  %s168_s19 = smov 80   ;;  %vm6_vm1 = vcmask 130048   ;;  %vm17_vm2 = vcmask 1048448   ;;  %vm28_vm3 = vcmask 917248   ;;  %s264_s0 = inlined_call_operand.vmem [shape: f32[64,16], index: 0, kind: input, shape index: {}]   ;;  %s265_s1 = inlined_call_operand.vmem [shape: f32[1,1024], index: 1, kind: output, shape index: {}]  }
   0x1   :  { %v139_v0 = vld [vmem:[%s264_s0 + $0x7] ss:$8 sm:$0xf]   ;;  %v143_v2 = vld [vmem:[%s264_s0 + $0x5] ss:$8 sm:$0xf]  }
   0x2   :  { %v140_v1 = vld [vmem:[%s264_s0 + $0x7] ss:$8 sm:$0xf0]   ;;  %v144_v4 = vld [vmem:[%s264_s0 + $0x5] ss:$8 sm:$0xf0]  }
   0x3   :  { %v14_v3 = vsel %vm4_vm0, %v140_v1, %v139_v0  ;;  %v141_v5 = vld [vmem:[%s264_s0 + $0x6] ss:$8 sm:$0xf]   ;;  %v36_v6 = vsel %vm4_vm0, %v144_v4, %v143_v2  ;;  %v145_v9 = vld [vmem:[%s264_s0 + $0x4] ss:$8 sm:$0xf]  }
   0x4   :  { %15 = vrot.lane.b32.xlu0 %v14_v3, %s167_s16  ;;  %v142_v7 = vld [vmem:[%s264_s0 + $0x6] ss:$8 sm:$0xf0]   ;;  %37 = vrot.lane.b32.xlu1 %v36_v6, %s168_s19  ;;  %v146_v10 = vld [vmem:[%s264_s0 + $0x4] ss:$8 sm:$0xf0]  }
   0x5   :  { %v25_v8 = vsel %vm4_vm0, %v142_v7, %v141_v5  ;;  %v47_v11 = vsel %vm4_vm0, %v146_v10, %v145_v9  ;;  %v147_v12 = vld [vmem:[%s264_s0 + $0x3] ss:$8 sm:$0xf]   ;;  %v149_v14 = vld [vmem:[%s264_s0 + $0x2] ss:$8 sm:$0xf]  }
   0x6   :  { %v148_v13 = vld [vmem:[%s264_s0 + $0x3] ss:$8 sm:$0xf0]   ;;  %s169_s30 = smov 96   ;;  %s170_s4 = smov 64   ;;  %vm39_vm4 = vcmask 786048  }
   0x7   :  { %v150_v15 = vld [vmem:[%s264_s0 + $0x2] ss:$8 sm:$0xf0]   ;;  %v58_v16 = vsel %vm4_vm0, %v148_v13, %v147_v12  ;;  %v151_v17 = vld [vmem:[%s264_s0 + $0x1] ss:$8 sm:$0xf]  }
   0x8   :  { %26 = vrot.lane.b32.xlu0 %v25_v8, %s169_s30  ;;  %48 = vrot.lane.b32.xlu1 %v47_v11, %s170_s4  ;;  %v152_v18 = vld [vmem:[%s264_s0 + $0x1] ss:$8 sm:$0xf0]   ;;  %v69_v19 = vsel %vm4_vm0, %v150_v15, %v149_v14  ;;  %v2_v20 = vld [vmem:[%s264_s0] ss:$8 sm:$0xf]  }
   0x9   :  { %v3_v21 = vld [vmem:[%s264_s0] ss:$8 sm:$0xf0]   ;;  %s171_s0 = smov 48   ;;  %s172_s13 = smov 32   ;;  %v80_v23 = vsel %vm4_vm0, %v152_v18, %v151_v17  ;;  %vm50_vm5 = vcmask 654848  }
   0xa   :  { %v5_v22 = vsel %vm4_vm0, %v3_v21, %v2_v20  ;;  %s173_s14 = smov 16   ;;  %vm61_vm6 = vcmask 523648   ;;  %vm72_vm7 = vcmask 392448   ;;  %vm83_vm8 = vcmask 261248  }
   0xb   :  { %7 = vst.msk [vmem:[#allocation0] ss:$8 sm:$0xf] %vm6_vm1, %v5_v22   ;;  %8 = vst.msk [vmem:[#allocation0] ss:$8 sm:$0xf0] %vm6_vm1, %v5_v22  }
   0xc   :  { %59 = vrot.lane.b32.xlu0 %v58_v16, %s171_s0  ;;  %70 = vrot.lane.b32.xlu1 %v69_v19, %s172_s13 }
  0x10   :  { %81 = vrot.lane.b32.xlu0 %v80_v23, %s173_s14 }
  0x76   :  { %v16_v24 = vpop.permute.xlu0 %15   ;;  %v38_v25 = vpop.permute.xlu1 %37  }
  0x77   :  { %18 = vst.msk [vmem:[#allocation0] ss:$8 sm:$0xf] %vm17_vm2, %v16_v24   ;;  %19 = vst.msk [vmem:[#allocation0] ss:$8 sm:$0xf0] %vm17_vm2, %v16_v24  }
  0x7a   :  { %v27_v26 = vpop.permute.xlu0 %26   ;;  %v49_v27 = vpop.permute.xlu1 %48  }
  0x7b   :  { %29 = vst.msk [vmem:[#allocation0] ss:$8 sm:$0xf] %vm28_vm3, %v27_v26   ;;  %30 = vst.msk [vmem:[#allocation0] ss:$8 sm:$0xf0] %vm28_vm3, %v27_v26  }
  0x7c   :  { %40 = vst.msk [vmem:[#allocation0] ss:$8 sm:$0xf] %vm39_vm4, %v38_v25   ;;  %41 = vst.msk [vmem:[#allocation0] ss:$8 sm:$0xf0] %vm39_vm4, %v38_v25  }
  0x7d   :  { %51 = vst.msk [vmem:[#allocation0] ss:$8 sm:$0xf] %vm50_vm5, %v49_v27   ;;  %52 = vst.msk [vmem:[#allocation0] ss:$8 sm:$0xf0] %vm50_vm5, %v49_v27  }
  0x7e   :  { %v60_v28 = vpop.permute.xlu0 %59   ;;  %v71_v29 = vpop.permute.xlu1 %70  }
  0x7f   :  { %62 = vst.msk [vmem:[#allocation0] ss:$8 sm:$0xf] %vm61_vm6, %v60_v28   ;;  %63 = vst.msk [vmem:[#allocation0] ss:$8 sm:$0xf0] %vm61_vm6, %v60_v28  }
  0x80   :  { %73 = vst.msk [vmem:[#allocation0] ss:$8 sm:$0xf] %vm72_vm7, %v71_v29   ;;  %74 = vst.msk [vmem:[#allocation0] ss:$8 sm:$0xf0] %vm72_vm7, %v71_v29  }
  0x82   :  { %v82_v30 = vpop.permute.xlu0 %81  }
  0x83   :  { %84 = vst.msk [vmem:[#allocation0] ss:$8 sm:$0xf] %vm83_vm8, %v82_v30   ;;  %85 = vst.msk [vmem:[#allocation0] ss:$8 sm:$0xf0] %vm83_vm8, %v82_v30  }
  0x8a   :  { %v89_v31 = vld [vmem:[#allocation0] sm:$0x1]  ;;  %v93_v32 = vld [vmem:[#allocation0 + $0x8] sm:$0x1]  ;;  %v98_v33 = vld [vmem:[#allocation0 + $0x10] sm:$0x1] }
  0x8b   :  { %91 = vst [vmem:[%s265_s1] sm:$0x1] %v89_v31  ;;  %153 = vst [vmem:[%s265_s1 + $0x1] sm:$0x1] %v93_v32  ;;  %v104_v34 = vld [vmem:[#allocation0 + $0x18] sm:$0x1] }
  0x8c   :  { %154 = vst [vmem:[%s265_s1 + $0x2] sm:$0x1] %v98_v33  ;;  %v110_v35 = vld [vmem:[#allocation0 + $0x20] sm:$0x1]  ;;  %v116_v36 = vld [vmem:[#allocation0 + $0x28] sm:$0x1] }
  0x8d   :  { %155 = vst [vmem:[%s265_s1 + $0x3] sm:$0x1] %v104_v34  ;;  %156 = vst [vmem:[%s265_s1 + $0x4] sm:$0x1] %v110_v35  ;;  %v122_v37 = vld [vmem:[#allocation0 + $0x30] sm:$0x1] }
  0x8e   :  { %157 = vst [vmem:[%s265_s1 + $0x5] sm:$0x1] %v116_v36  ;;  %v128_v38 = vld [vmem:[#allocation0 + $0x38] sm:$0x1]  ;;  %158 = vst [vmem:[%s265_s1 + $0x6] sm:$0x1] %v122_v37 }
  0x8f   :  { %159 = vst [vmem:[%s265_s1 + $0x7] sm:$0x1] %v128_v38 }

// kernel: chessbot_forward.1
= control target key start
LH: loop header
LB: loop body
LE: loop exit
PB: predicated region body
PF: predicated region fallthrough
CT: control target
= control target key end

     0   :  { %v5748_v3 = vmov 0   ;;  %vm283_vm0 = vcmask 523264   ;;  %vm4418_vm1 = vcmask 7168   ;;  %s7617_s1 = inlined_call_operand.vmem [shape: bf16[64,1024], index: 1, kind: input, shape index: {}]   ;;  %s7618_s0 = inlined_call_operand.vmem [shape: f32[8,64], index: 0, kind: input, shape index: {}]   ;;  %s7619_s3 = inlined_call_operand.vmem [shape: bf16[640,256], index: 3, kind: input, shape index: {}]   ;;  %s7620_s4 = inlined_call_operand.vmem [shape: bf16[640,256], index: 4, kind: input, shape index: {}]   ;;  %s7621_s5 = inlined_call_operand.vmem [shape: bf16[640,256], index: 5, kind: input, shape index: {}]   ;;  %s7622_s2 = inlined_call_operand.vmem [shape: f32[1,1024], index: 2, kind: input, shape index: {}]   ;;  %s7623_s6 = inlined_call_operand.vmem [shape: bf16[640,256], index: 6, kind: input, shape index: {}]   ;;  %s7624_s8 = inlined_call_operand.vmem [shape: bf16[768,256], index: 8, kind: input, shape index: {}]   ;;  %s7625_s9 = inlined_call_operand.vmem [shape: bf16[768,256], index: 9, kind: input, shape index: {}]   ;;  %s7626_s7 = inlined_call_operand.vmem [shape: f32[1,1024], index: 7, kind: input, shape index: {}]   ;;  %s7627_s12 = inlined_call_operand.<no memory space> [shape: f32[1,1], index: 12, kind: input, shape index: {}]   ;;  %s7628_s10 = inlined_call_operand.vmem [shape: f32[1,512], index: 10, kind: input, shape index: {}]   ;;  %s7629_s11 = inlined_call_operand.vmem [shape: f32[1,512], index: 11, kind: input, shape index: {}]   ;;  %s7630_s13 = inlined_call_operand.vmem [shape: f32[8,1], index: 13, kind: output, shape index: {}]  }
   0x1   :  { %v49_v0 = vld [vmem:[%s7617_s1] sm:$0xff]  ;;  %v50_v2 = vld [vmem:[%s7617_s1 + $0x8] sm:$0xff]  ;;  %319 = vmatprep.mubr.bf16.mxu0 %v5748_v3  ;;  %360 = vmatprep.mubr.bf16.mxu1 %v5748_v3  ;;  %v51_v31 = vld [vmem:[%s7617_s1 + $0x10] sm:$0xff] }
   0x2   :  { %v53_v1 = vld [vmem:[%s7617_s1 + $0x20] sm:$0xff]  ;;  %v54_v5 = vld [vmem:[%s7617_s1 + $0x28] sm:$0xff]  ;;  %v55_v32 = vld [vmem:[%s7617_s1 + $0x30] sm:$0xff] }
   0x3   :  { %v4425_v4 = vcombine.high %v49_v0, %v53_v1  ;;  %v4424_v6 = vcombine.low %v49_v0, %v53_v1  ;;  %v57_v7 = vld [vmem:[%s7617_s1 + $0x40] sm:$0xff]  ;;  %v4427_v9 = vcombine.high %v50_v2, %v54_v5  ;;  %v4426_v10 = vcombine.low %v50_v2, %v54_v5  ;;  %v58_v12 = vld [vmem:[%s7617_s1 + $0x48] sm:$0xff]  ;;  %v52_v33 = vld [vmem:[%s7617_s1 + $0x18] sm:$0xff] }
   0x4   :  { %v61_v8 = vld [vmem:[%s7617_s1 + $0x60] sm:$0xff]  ;;  %v62_v13 = vld [vmem:[%s7617_s1 + $0x68] sm:$0xff]  ;;  %v56_v34 = vld [vmem:[%s7617_s1 + $0x38] sm:$0xff]  ;;  %v4429_v38 = vcombine.high %v51_v31, %v55_v32  ;;  %v4428_v44 = vcombine.low %v51_v31, %v55_v32 }
   0x5   :  { %v4433_v11 = vcombine.high %v57_v7, %v61_v8  ;;  %v65_v14 = vld [vmem:[%s7617_s1 + $0x80] sm:$0xff]  ;;  %287 = vmatprep.subr.bf16.mxu0 %v4425_v4  ;;  %v4435_v15 = vcombine.high %v58_v12, %v62_v13  ;;  %v66_v17 = vld [vmem:[%s7617_s1 + $0x88] sm:$0xff]  ;;  %328 = vmatprep.subr.bf16.mxu1 %v4427_v9  ;;  %v4432_v19 = vcombine.low %v57_v7, %v61_v8  ;;  %v59_v39 = vld [vmem:[%s7617_s1 + $0x50] sm:$0xff] }
   0x6   :  { %v69_v16 = vld [vmem:[%s7617_s1 + $0xa0] sm:$0xff]  ;;  %v70_v18 = vld [vmem:[%s7617_s1 + $0xa8] sm:$0xff]  ;;  %288 = vmatpush1.bf16.msra.mxu0 %v4424_v6  ;;  %329 = vmatpush1.bf16.msra.mxu1 %v4426_v10  ;;  %v4434_v20 = vcombine.low %v58_v12, %v62_v13  ;;  %v63_v40 = vld [vmem:[%s7617_s1 + $0x70] sm:$0xff]  ;;  %v4431_v41 = vcombine.high %v52_v33, %v56_v34  ;;  %v4430_v49 = vcombine.low %v52_v33, %v56_v34 }
   0x7   :  { %289 = vmatprep.subr.bf16.mxu0 %v4433_v11  ;;  %v4441_v21 = vcombine.high %v65_v14, %v69_v16  ;;  %330 = vmatprep.subr.bf16.mxu1 %v4435_v15  ;;  %v4443_v22 = vcombine.high %v66_v17, %v70_v18  ;;  %v73_v23 = vld [vmem:[%s7617_s1 + $0xc0] sm:$0xff]  ;;  %v74_v25 = vld [vmem:[%s7617_s1 + $0xc8] sm:$0xff]  ;;  %v4440_v27 = vcombine.low %v65_v14, %v69_v16  ;;  %v60_v43 = vld [vmem:[%s7617_s1 + $0x58] sm:$0xff] }
   0x8   :  { %v77_v24 = vld [vmem:[%s7617_s1 + $0xe0] sm:$0xff]  ;;  %v78_v26 = vld [vmem:[%s7617_s1 + $0xe8] sm:$0xff]  ;;  %v4442_v28 = vcombine.low %v66_v17, %v70_v18  ;;  %v64_v45 = vld [vmem:[%s7617_s1 + $0x78] sm:$0xff]  ;;  %v4437_v46 = vcombine.high %v59_v39, %v63_v40  ;;  %v4436_v52 = vcombine.low %v59_v39, %v63_v40 }
   0x9   :  { %v4449_v29 = vcombine.high %v73_v23, %v77_v24  ;;  %v4451_v30 = vcombine.high %v74_v25, %v78_v26  ;;  %v4448_v35 = vcombine.low %v73_v23, %v77_v24  ;;  %v47_v36 = vld [vmem:[%s7618_s0] sm:$0xff]  ;;  %v4450_v37 = vcombine.low %v74_v25, %v78_v26  ;;  %v67_v47 = vld [vmem:[%s7617_s1 + $0x90] sm:$0xff]  ;;  %v68_v51 = vld [vmem:[%s7617_s1 + $0x98] sm:$0xff] }
   0xa   :  { %290 = vmatpush1.bf16.msra.mxu0 %v4432_v19  ;;  %331 = vmatpush1.bf16.msra.mxu1 %v4434_v20  ;;  %v48_v42 = vpack.c.bf16 %v47_v36, %v47_v36  ;;  %v71_v48 = vld [vmem:[%s7617_s1 + $0xb0] sm:$0xff]  ;;  %v4439_v50 = vcombine.high %v60_v43, %v64_v45  ;;  %v72_v53 = vld [vmem:[%s7617_s1 + $0xb8] sm:$0xff]  ;;  %v4438_v57 = vcombine.low %v60_v43, %v64_v45  ;;  %v4977_v2 = vld [vmem:[%s7619_s3 + $0x4] ss:$8 sps:$4 sm:$0xff]  }
   0xb   :  { %291 = vmatprep.subr.bf16.mxu0 %v4441_v21  ;;  %332 = vmatprep.subr.bf16.mxu1 %v4443_v22  ;;  %v4445_v54 = vcombine.high %v67_v47, %v71_v48  ;;  %v75_v55 = vld [vmem:[%s7617_s1 + $0xd0] sm:$0xff]  ;;  %v4447_v58 = vcombine.high %v68_v51, %v72_v53  ;;  %v76_v59 = vld [vmem:[%s7617_s1 + $0xd8] sm:$0xff]  ;;  %v4444_v60 = vcombine.low %v67_v47, %v71_v48  ;;  %v4980_v5 = vld [vmem:[%s7619_s3 + $0x104] ss:$8 sps:$4 sm:$0xff]  }
   0xc   :  { %v79_v56 = vld [vmem:[%s7617_s1 + $0xf0] sm:$0xff]  ;;  %v80_v61 = vld [vmem:[%s7617_s1 + $0xf8] sm:$0xff]  ;;  %v4446_v63 = vcombine.low %v68_v51, %v72_v53  ;;  %v4975_v6 = vld [vmem:[%s7619_s3] ss:$8 sps:$4 sm:$0xff]  }
   0xd   :  { %v4453_v62 = vcombine.high %v75_v55, %v79_v56  ;;  %v4455_v0 = vcombine.high %v76_v59, %v80_v61  ;;  %v4452_v1 = vcombine.low %v75_v55, %v79_v56  ;;  %v4454_v4 = vcombine.low %v76_v59, %v80_v61  ;;  %v4983_v7 = vld [vmem:[%s7619_s3 + $0x14] ss:$8 sps:$4 sm:$0xff]   ;;  %v4978_v8 = vld [vmem:[%s7619_s3 + $0x100] ss:$8 sps:$4 sm:$0xff]   ;;  %v4981_v10 = vld [vmem:[%s7619_s3 + $0x10] ss:$8 sps:$4 sm:$0xff]  }
   0xe   :  { %292 = vmatpush1.bf16.msra.mxu0 %v4440_v27  ;;  %333 = vmatpush1.bf16.msra.mxu1 %v4442_v28  ;;  %v4986_v9 = vld [vmem:[%s7619_s3 + $0x114] ss:$8 sps:$4 sm:$0xff]   ;;  %v4989_v11 = vld [vmem:[%s7619_s3 + $0x24] ss:$8 sps:$4 sm:$0xff]   ;;  %v4984_v12 = vld [vmem:[%s7619_s3 + $0x110] ss:$8 sps:$4 sm:$0xff]  }
   0xf   :  { %293 = vmatprep.subr.bf16.mxu0 %v4449_v29  ;;  %334 = vmatprep.subr.bf16.mxu1 %v4451_v30  ;;  %v4992_v13 = vld [vmem:[%s7619_s3 + $0x124] ss:$8 sps:$4 sm:$0xff]   ;;  %v4987_v14 = vld [vmem:[%s7619_s3 + $0x20] ss:$8 sps:$4 sm:$0xff]   ;;  %v4995_v15 = vld [vmem:[%s7619_s3 + $0x34] ss:$8 sps:$4 sm:$0xff]  }
  0x10   :  { %v4990_v16 = vld [vmem:[%s7619_s3 + $0x120] ss:$8 sps:$4 sm:$0xff]   ;;  %v4998_v17 = vld [vmem:[%s7619_s3 + $0x134] ss:$8 sps:$4 sm:$0xff]   ;;  %v4993_v18 = vld [vmem:[%s7619_s3 + $0x30] ss:$8 sps:$4 sm:$0xff]  }
  0x11   :  { %v5001_v19 = vld [vmem:[%s7619_s3 + $0x44] ss:$8 sps:$4 sm:$0xff]   ;;  %v4996_v20 = vld [vmem:[%s7619_s3 + $0x130] ss:$8 sps:$4 sm:$0xff]   ;;  %v4999_v21 = vld [vmem:[%s7619_s3 + $0x40] ss:$8 sps:$4 sm:$0xff]  }
  0x12   :  { %294 = vmatpush1.bf16.msra.mxu0 %v4448_v35  ;;  %335 = vmatpush1.bf16.msra.mxu1 %v4450_v37  ;;  %v5004_v22 = vld [vmem:[%s7619_s3 + $0x144] ss:$8 sps:$4 sm:$0xff]   ;;  %v5002_v23 = vld [vmem:[%s7619_s3 + $0x140] ss:$8 sps:$4 sm:$0xff]   ;;  %v5007_v24 = vld [vmem:[%s7619_s3 + $0x54] ss:$8 sps:$4 sm:$0xff]  }
  0x13   :  { %369 = vmatprep.subr.bf16.mxu0 %v4429_v38  ;;  %410 = vmatprep.subr.bf16.mxu1 %v4431_v41  ;;  %v5010_v25 = vld [vmem:[%s7619_s3 + $0x154] ss:$8 sps:$4 sm:$0xff]   ;;  %v5005_v26 = vld [vmem:[%s7619_s3 + $0x50] ss:$8 sps:$4 sm:$0xff]   ;;  %v5013_v27 = vld [vmem:[%s7619_s3 + $0x64] ss:$8 sps:$4 sm:$0xff]  }
  0x14   :  { %v5008_v28 = vld [vmem:[%s7619_s3 + $0x150] ss:$8 sps:$4 sm:$0xff]   ;;  %v5016_v29 = vld [vmem:[%s7619_s3 + $0x164] ss:$8 sps:$4 sm:$0xff]   ;;  %v5011_v30 = vld [vmem:[%s7619_s3 + $0x60] ss:$8 sps:$4 sm:$0xff]  }
  0x15   :  { %4456 = vmatmul.mubr.msk.bf16.vlgmr.msra.gmra.mrb[0].mxu0 %vm283_vm0, %v48_v42  ;;  %4457 = vmatmul.mubr.msk.bf16.vlgmr.msra.gmra.mrb[0].mxu1 %vm283_vm0, %v48_v42  ;;  %v5019_v31 = vld [vmem:[%s7619_s3 + $0x74] ss:$8 sps:$4 sm:$0xff]   ;;  %v5014_v32 = vld [vmem:[%s7619_s3 + $0x160] ss:$8 sps:$4 sm:$0xff]   ;;  %v5017_v34 = vld [vmem:[%s7619_s3 + $0x70] ss:$8 sps:$4 sm:$0xff]  }
  0x16   :  { %370 = vmatpush1.bf16.msra.mxu0 %v4428_v44  ;;  %401 = vmatprep.mubr.bf16.mxu0 %v5748_v3  ;;  %v5022_v33 = vld [vmem:[%s7619_s3 + $0x174] ss:$8 sps:$4 sm:$0xff]   ;;  %v5025_v35 = vld [vmem:[%s7619_s3 + $0x84] ss:$8 sps:$4 sm:$0xff]   ;;  %v5020_v36 = vld [vmem:[%s7619_s3 + $0x170] ss:$8 sps:$4 sm:$0xff]  }
  0x17   :  { %371 = vmatprep.subr.bf16.mxu0 %v4437_v46  ;;  %411 = vmatpush1.bf16.msra.mxu1 %v4430_v49  ;;  %v5028_v37 = vld [vmem:[%s7619_s3 + $0x184] ss:$8 sps:$4 sm:$0xff]   ;;  %v5023_v38 = vld [vmem:[%s7619_s3 + $0x80] ss:$8 sps:$4 sm:$0xff]   ;;  %v5031_v39 = vld [vmem:[%s7619_s3 + $0x94] ss:$8 sps:$4 sm:$0xff]  }
  0x18   :  { %442 = vmatprep.mubr.bf16.mxu1 %v5748_v3  ;;  %412 = vmatprep.subr.bf16.mxu1 %v4439_v50  ;;  %v5026_v40 = vld [vmem:[%s7619_s3 + $0x180] ss:$8 sps:$4 sm:$0xff]   ;;  %v5034_v41 = vld [vmem:[%s7619_s3 + $0x194] ss:$8 sps:$4 sm:$0xff]   ;;  %v5037_v43 = vld [vmem:[%s7619_s3 + $0xa4] ss:$8 sps:$4 sm:$0xff]  }
  0x19   :  { %v5032_v44 = vld [vmem:[%s7619_s3 + $0x190] ss:$8 sps:$4 sm:$0xff]   ;;  %v5040_v45 = vld [vmem:[%s7619_s3 + $0x1a4] ss:$8 sps:$4 sm:$0xff]   ;;  %v5035_v46 = vld [vmem:[%s7619_s3 + $0xa0] ss:$8 sps:$4 sm:$0xff]  }
  0x1a   :  { %372 = vmatpush1.bf16.msra.mxu0 %v4436_v52  ;;  %v5043_v47 = vld [vmem:[%s7619_s3 + $0xb4] ss:$8 sps:$4 sm:$0xff]   ;;  %v5038_v48 = vld [vmem:[%s7619_s3 + $0x1a0] ss:$8 sps:$4 sm:$0xff]   ;;  %v5041_v50 = vld [vmem:[%s7619_s3 + $0xb0] ss:$8 sps:$4 sm:$0xff]  }
  0x1b   :  { %373 = vmatprep.subr.bf16.mxu0 %v4445_v54  ;;  %413 = vmatpush1.bf16.msra.mxu1 %v4438_v57  ;;  %v5046_v49 = vld [vmem:[%s7619_s3 + $0x1b4] ss:$8 sps:$4 sm:$0xff]   ;;  %v5049_v51 = vld [vmem:[%s7619_s3 + $0xc4] ss:$8 sps:$4 sm:$0xff]   ;;  %v5044_v52 = vld [vmem:[%s7619_s3 + $0x1b0] ss:$8 sps:$4 sm:$0xff]  }
  0x1c   :  { %414 = vmatprep.subr.bf16.mxu1 %v4447_v58  ;;  %v5052_v53 = vld [vmem:[%s7619_s3 + $0x1c4] ss:$8 sps:$4 sm:$0xff]   ;;  %v5047_v54 = vld [vmem:[%s7619_s3 + $0xc0] ss:$8 sps:$4 sm:$0xff]   ;;  %v5055_v55 = vld [vmem:[%s7619_s3 + $0xd4] ss:$8 sps:$4 sm:$0xff]  }
  0x1d   :  { %v5050_v56 = vld [vmem:[%s7619_s3 + $0x1c0] ss:$8 sps:$4 sm:$0xff]   ;;  %v5058_v57 = vld [vmem:[%s7619_s3 + $0x1d4] ss:$8 sps:$4 sm:$0xff]   ;;  %v5053_v58 = vld [vmem:[%s7619_s3 + $0xd0] ss:$8 sps:$4 sm:$0xff]  }
  0x1e   :  { %374 = vmatpush1.bf16.msra.mxu0 %v4444_v60  ;;  %v5056_v59 = vld [vmem:[%s7619_s3 + $0x1d0] ss:$8 sps:$4 sm:$0xff]   ;;  %v5061_v60 = vld [vmem:[%s7619_s3 + $0xe4] ss:$8 sps:$4 sm:$0xff]  }
  0x1f   :  { %375 = vmatprep.subr.bf16.mxu0 %v4453_v62  ;;  %415 = vmatpush1.bf16.msra.mxu1 %v4446_v63  ;;  %v5064_v61 = vld [vmem:[%s7619_s3 + $0x1e4] ss:$8 sps:$4 sm:$0xff]   ;;  %v5059_v62 = vld [vmem:[%s7619_s3 + $0xe0] ss:$8 sps:$4 sm:$0xff]  }
  0x20   :  { %416 = vmatprep.subr.bf16.mxu1 %v4455_v0  ;;  %v5062_v63 = vld [vmem:[%s7619_s3 + $0x1e0] ss:$8 sps:$4 sm:$0xff]   ;;  %v5067_v0 = vld [vmem:[%s7619_s3 + $0xf4] ss:$8 sps:$4 sm:$0xff]  }
  0x22   :  { %376 = vmatpush1.bf16.msra.mxu0 %v4452_v1  ;;  %v5070_v1 = vld [vmem:[%s7619_s3 + $0x1f4] ss:$8 sps:$4 sm:$0xff]  }
  0x23   :  { %947 = vmatprep.subr.bf16.mxu0 %v4977_v2  ;;  %417 = vmatpush1.bf16.msra.mxu1 %v4454_v4  ;;  %v5065_v2 = vld [vmem:[%s7619_s3 + $0xf0] ss:$8 sps:$4 sm:$0xff]  }
  0x24   :  { %988 = vmatprep.subr.bf16.mxu1 %v4980_v5  ;;  %v5068_v4 = vld [vmem:[%s7619_s3 + $0x1f0] ss:$8 sps:$4 sm:$0xff]   ;;  %v5073_v5 = vld [vmem:[%s7619_s3 + $0x204] ss:$8 sps:$4 sm:$0xff]  }
  0x25   :  { %4458 = vmatmul.mubr.msk.bf16.vlgmr.msra.gmra.mrb[4].mxu0 %vm283_vm0, %v48_v42 }
  0x26   :  { %948 = vmatpush1.bf16.msra.mxu0 %v4975_v6  ;;  %4459 = vmatmul.mubr.msk.bf16.vlgmr.msra.gmra.mrb[4].mxu1 %vm283_vm0, %v48_v42  ;;  %v5029_v42 = vld [vmem:[%s7619_s3 + $0x90] ss:$8 sps:$4 sm:$0xff]   ;;  %v5076_v6 = vld [vmem:[%s7620_s4 + $0x4] ss:$8 sps:$4 sm:$0xff]  }
  0x27   :  { %949 = vmatprep.subr.bf16.mxu0 %v4983_v7  ;;  %989 = vmatpush1.bf16.msra.mxu1 %v4978_v8  ;;  %v83_v7 = vlaneseq }
  0x28   :  { %990 = vmatprep.subr.bf16.mxu1 %v4986_v9  ;;  %v6129_v9 = vld [vmem:[%s7622_s2] sm:$0xff] }
  0x29   :  { %v6124_v8 = vshrl.u32 %v83_v7, 7 }
  0x2a   :  { %950 = vmatpush1.bf16.msra.mxu0 %v4981_v10 }
  0x2b   :  { %951 = vmatprep.subr.bf16.mxu0 %v4989_v11  ;;  %991 = vmatpush1.bf16.msra.mxu1 %v4984_v12  ;;  %v6132_v10 = vsub.s32 0, %v6124_v8  ;;  %v6135_v11 = vsub.s32 2, %v6124_v8  ;;  %v6138_v12 = vsub.s32 1, %v6124_v8 }
  0x2c   :  { %992 = vmatprep.subr.bf16.mxu1 %v4992_v13  ;;  %v6141_v13 = vsub.s32 3, %v6124_v8 }
  0x2e   :  { %952 = vmatpush1.bf16.msra.mxu0 %v4987_v14  ;;  %v86_v14 = vrot.slane %v6129_v9, %v6132_v10 }
  0x2f   :  { %953 = vmatprep.subr.bf16.mxu0 %v4995_v15  ;;  %993 = vmatpush1.bf16.msra.mxu1 %v4990_v16  ;;  %v94_v15 = vrot.slane %v6129_v9, %v6135_v11  ;;  %v90_v16 = vrot.slane %v6129_v9, %v6138_v12 }
  0x30   :  { %994 = vmatprep.subr.bf16.mxu1 %v4998_v17  ;;  %v98_v17 = vrot.slane %v6129_v9, %v6141_v13 }
  0x32   :  { %954 = vmatpush1.bf16.msra.mxu0 %v4993_v18 }
  0x33   :  { %955 = vmatprep.subr.bf16.mxu0 %v5001_v19  ;;  %995 = vmatpush1.bf16.msra.mxu1 %v4996_v20 }
  0x34   :  { %996 = vmatprep.subr.bf16.mxu1 %v5004_v22 }
  0x36   :  { %956 = vmatpush1.bf16.msra.mxu0 %v4999_v21 }
  0x37   :  { %957 = vmatprep.subr.bf16.mxu0 %v5007_v24  ;;  %997 = vmatpush1.bf16.msra.mxu1 %v5002_v23 }
  0x38   :  { %998 = vmatprep.subr.bf16.mxu1 %v5010_v25 }
  0x3a   :  { %958 = vmatpush1.bf16.msra.mxu0 %v5005_v26 }
  0x3b   :  { %959 = vmatprep.subr.bf16.mxu0 %v5013_v27  ;;  %999 = vmatpush1.bf16.msra.mxu1 %v5008_v28 }
  0x3c   :  { %1000 = vmatprep.subr.bf16.mxu1 %v5016_v29 }
  0x3e   :  { %960 = vmatpush1.bf16.msra.mxu0 %v5011_v30 }
  0x3f   :  { %961 = vmatprep.subr.bf16.mxu0 %v5019_v31  ;;  %1001 = vmatpush1.bf16.msra.mxu1 %v5014_v32 }
  0x40   :  { %1002 = vmatprep.subr.bf16.mxu1 %v5022_v33 }
  0x42   :  { %962 = vmatpush1.bf16.msra.mxu0 %v5017_v34  ;;  %v5071_v34 = vld [vmem:[%s7619_s3 + $0x200] ss:$8 sps:$4 sm:$0xff]  }
  0x43   :  { %963 = vmatprep.subr.bf16.mxu0 %v5025_v35  ;;  %1003 = vmatpush1.bf16.msra.mxu1 %v5020_v36 }
  0x44   :  { %1004 = vmatprep.subr.bf16.mxu1 %v5028_v37 }
  0x46   :  { %964 = vmatpush1.bf16.msra.mxu0 %v5023_v38 }
  0x47   :  { %965 = vmatprep.subr.bf16.mxu0 %v5031_v39  ;;  %1005 = vmatpush1.bf16.msra.mxu1 %v5026_v40  ;;  %v5074_v39 = vld [vmem:[%s7620_s4] ss:$8 sps:$4 sm:$0xff]   ;;  %v5079_v40 = vld [vmem:[%s7619_s3 + $0x214] ss:$8 sps:$4 sm:$0xff]  }
  0x48   :  { %1006 = vmatprep.subr.bf16.mxu1 %v5034_v41  ;;  %v5077_v41 = vld [vmem:[%s7619_s3 + $0x210] ss:$8 sps:$4 sm:$0xff]  }
  0x4a   :  { %966 = vmatpush1.bf16.msra.mxu0 %v5029_v42  ;;  %v5082_v42 = vld [vmem:[%s7620_s4 + $0x14] ss:$8 sps:$4 sm:$0xff]  }
  0x4b   :  { %967 = vmatprep.subr.bf16.mxu0 %v5037_v43  ;;  %1007 = vmatpush1.bf16.msra.mxu1 %v5032_v44  ;;  %v5080_v43 = vld [vmem:[%s7620_s4 + $0x10] ss:$8 sps:$4 sm:$0xff]   ;;  %v5085_v44 = vld [vmem:[%s7619_s3 + $0x224] ss:$8 sps:$4 sm:$0xff]  }
  0x4c   :  { %1008 = vmatprep.subr.bf16.mxu1 %v5040_v45  ;;  %v5083_v45 = vld [vmem:[%s7619_s3 + $0x220] ss:$8 sps:$4 sm:$0xff]  }
  0x4e   :  { %968 = vmatpush1.bf16.msra.mxu0 %v5035_v46  ;;  %v5088_v46 = vld [vmem:[%s7620_s4 + $0x24] ss:$8 sps:$4 sm:$0xff]  }
  0x4f   :  { %969 = vmatprep.subr.bf16.mxu0 %v5043_v47  ;;  %1009 = vmatpush1.bf16.msra.mxu1 %v5038_v48  ;;  %v5086_v47 = vld [vmem:[%s7620_s4 + $0x20] ss:$8 sps:$4 sm:$0xff]   ;;  %v5091_v48 = vld [vmem:[%s7619_s3 + $0x234] ss:$8 sps:$4 sm:$0xff]  }
  0x50   :  { %1010 = vmatprep.subr.bf16.mxu1 %v5046_v49  ;;  %v5094_v49 = vld [vmem:[%s7620_s4 + $0x34] ss:$8 sps:$4 sm:$0xff]  }
  0x52   :  { %970 = vmatpush1.bf16.msra.mxu0 %v5041_v50 }
  0x53   :  { %971 = vmatprep.subr.bf16.mxu0 %v5049_v51  ;;  %1011 = vmatpush1.bf16.msra.mxu1 %v5044_v52  ;;  %v5089_v52 = vld [vmem:[%s7619_s3 + $0x230] ss:$8 sps:$4 sm:$0xff]  }
  0x54   :  { %1012 = vmatprep.subr.bf16.mxu1 %v5052_v53 }
  0x56   :  { %972 = vmatpush1.bf16.msra.mxu0 %v5047_v54  ;;  %v5092_v54 = vld [vmem:[%s7620_s4 + $0x30] ss:$8 sps:$4 sm:$0xff]  }
  0x57   :  { %973 = vmatprep.subr.bf16.mxu0 %v5055_v55  ;;  %1013 = vmatpush1.bf16.msra.mxu1 %v5050_v56  ;;  %v5097_v55 = vld [vmem:[%s7619_s3 + $0x244] ss:$8 sps:$4 sm:$0xff]  }
  0x58   :  { %1014 = vmatprep.subr.bf16.mxu1 %v5058_v57  ;;  %v5100_v57 = vld [vmem:[%s7620_s4 + $0x44] ss:$8 sps:$4 sm:$0xff]  }
  0x5a   :  { %974 = vmatpush1.bf16.msra.mxu0 %v5053_v58  ;;  %v101_v58 = vsub.s32 4, %v6124_v8 }
  0x5b   :  { %1015 = vmatpush1.bf16.msra.mxu1 %v5056_v59  ;;  %975 = vmatprep.subr.bf16.mxu0 %v5061_v60  ;;  %v5095_v59 = vld [vmem:[%s7619_s3 + $0x240] ss:$8 sps:$4 sm:$0xff]  }
  0x5c   :  { %1016 = vmatprep.subr.bf16.mxu1 %v5064_v61  ;;  %v5098_v60 = vld [vmem:[%s7620_s4 + $0x40] ss:$8 sps:$4 sm:$0xff]   ;;  %v5103_v61 = vld [vmem:[%s7619_s3 + $0x254] ss:$8 sps:$4 sm:$0xff]  }
  0x5e   :  { %976 = vmatpush1.bf16.msra.mxu0 %v5059_v62  ;;  %v5106_v62 = vld [vmem:[%s7620_s4 + $0x54] ss:$8 sps:$4 sm:$0xff]  }
  0x5f   :  { %1017 = vmatpush1.bf16.msra.mxu1 %v5062_v63  ;;  %977 = vmatprep.subr.bf16.mxu0 %v5067_v0  ;;  %v102_v63 = vrot.slane %v6129_v9, %v101_v58  ;;  %v5101_v0 = vld [vmem:[%s7619_s3 + $0x250] ss:$8 sps:$4 sm:$0xff]  }
  0x60   :  { %1018 = vmatprep.subr.bf16.mxu1 %v5070_v1  ;;  %v5104_v1 = vld [vmem:[%s7620_s4 + $0x50] ss:$8 sps:$4 sm:$0xff]  }
  0x62   :  { %978 = vmatpush1.bf16.msra.mxu0 %v5065_v2  ;;  %v5109_v2 = vld [vmem:[%s7619_s3 + $0x264] ss:$8 sps:$4 sm:$0xff]  }
  0x63   :  { %1019 = vmatpush1.bf16.msra.mxu1 %v5068_v4  ;;  %1029 = vmatprep.subr.bf16.mxu0 %v5073_v5  ;;  %v5112_v5 = vld [vmem:[%s7620_s4 + $0x64] ss:$8 sps:$4 sm:$0xff]  }
  0x64   :  { %1550 = vmatprep.subr.bf16.mxu1 %v5076_v6 }
  0xe8   :  { %v321_v18 = vpop.f32.mrb[0].mxu0  ;;  %v362_v20 = vpop.f32.mrb[0].mxu1 }
  0xe9   :  { %v322_v19 = vadd.f32 %v321_v18, %v86_v14  ;;  %v323_v21 = vpop.f32.mrb[1].mxu0  ;;  %v363_v22 = vadd.f32 %v362_v20, %v94_v15  ;;  %v364_v24 = vpop.f32.mrb[1].mxu1  ;;  %v5107_v15 = vld [vmem:[%s7619_s3 + $0x260] ss:$8 sps:$4 sm:$0xff]   ;;  %v5115_v18 = vld [vmem:[%s7619_s3 + $0x274] ss:$8 sps:$4 sm:$0xff]  }
  0xea   :  { %v324_v23 = vadd.f32 %v323_v21, %v90_v16  ;;  %v325_v25 = vpop.f32.mrb[2].mxu0  ;;  %v365_v27 = vadd.f32 %v364_v24, %v98_v17  ;;  %v366_v28 = vpop.f32.mrb[2].mxu1  ;;  %v5110_v17 = vld [vmem:[%s7620_s4 + $0x60] ss:$8 sps:$4 sm:$0xff]   ;;  %v5113_v21 = vld [vmem:[%s7619_s3 + $0x270] ss:$8 sps:$4 sm:$0xff]  }
  0xeb   :  { %v451_v26 = vmax.f32 %v322_v19, 0.0  ;;  %v326_v29 = vpop.f32.mrb[3].mxu0  ;;  %v453_v30 = vmax.f32 %v363_v22, 0.0  ;;  %v367_v32 = vpop.f32.mrb[3].mxu1  ;;  %v5118_v19 = vld [vmem:[%s7620_s4 + $0x74] ss:$8 sps:$4 sm:$0xff]  }
  0xec   :  { %v452_v31 = vmax.f32 %v324_v23, 0.0  ;;  %v454_v33 = vmax.f32 %v365_v27, 0.0  ;;  %v5116_v22 = vld [vmem:[%s7620_s4 + $0x70] ss:$8 sps:$4 sm:$0xff]   ;;  %v5124_v23 = vld [vmem:[%s7620_s4 + $0x104] ss:$8 sps:$4 sm:$0xff]  }
  0xed   :  { %v6154_v35 = vpack.c.bf16 %v453_v30, %v453_v30  ;;  %v459_v37 = vpack.c.bf16 %v451_v26, %v451_v26  ;;  %v5121_v24 = vld [vmem:[%s7620_s4 + $0x84] ss:$8 sps:$4 sm:$0xff]   ;;  %v5122_v26 = vld [vmem:[%s7620_s4 + $0x100] ss:$8 sps:$4 sm:$0xff]   ;;  %v5130_v28 = vld [vmem:[%s7620_s4 + $0x114] ss:$8 sps:$4 sm:$0xff]  }
  0xee   :  { %v6156_v36 = vpack.c.bf16 %v452_v31, %v452_v31  ;;  %v6158_v38 = vpack.c.bf16 %v454_v33, %v454_v33  ;;  %v5119_v27 = vld [vmem:[%s7620_s4 + $0x80] ss:$8 sps:$4 sm:$0xff]   ;;  %v5127_v29 = vld [vmem:[%s7620_s4 + $0x94] ss:$8 sps:$4 sm:$0xff]   ;;  %v5128_v30 = vld [vmem:[%s7620_s4 + $0x110] ss:$8 sps:$4 sm:$0xff]  }
  0xef   :  { %v5125_v31 = vld [vmem:[%s7620_s4 + $0x90] ss:$8 sps:$4 sm:$0xff]   ;;  %v5136_v32 = vld [vmem:[%s7620_s4 + $0x124] ss:$8 sps:$4 sm:$0xff]  }
  0xf0   :  { %979 = vmatprep.mubr.bf16.mxu0 %v6156_v36  ;;  %1020 = vmatprep.mubr.bf16.mxu1 %v6158_v38  ;;  %v5133_v33 = vld [vmem:[%s7620_s4 + $0xa4] ss:$8 sps:$4 sm:$0xff]  }
  0xf1   :  { %980 = vmatmul.mubr.bf16.vlgmr.msra.gmra.mrb[8].mxu0 %v459_v37  ;;  %1021 = vmatmul.mubr.bf16.vlgmr.msra.gmra.mrb[8].mxu1 %v6154_v35  ;;  %v5131_v37 = vld [vmem:[%s7620_s4 + $0xa0] ss:$8 sps:$4 sm:$0xff]  }
  0xf2   :  { %1030 = vmatpush1.bf16.msra.mxu0 %v5071_v34  ;;  %1551 = vmatpush1.bf16.msra.mxu1 %v5074_v39  ;;  %v5134_v34 = vld [vmem:[%s7620_s4 + $0x120] ss:$8 sps:$4 sm:$0xff]   ;;  %v5139_v39 = vld [vmem:[%s7620_s4 + $0xb4] ss:$8 sps:$4 sm:$0xff]  }
  0xf3   :  { %1582 = vmatprep.mubr.bf16.mxu1 %v6154_v35  ;;  %1031 = vmatprep.subr.bf16.mxu0 %v5079_v40  ;;  %v5142_v40 = vld [vmem:[%s7620_s4 + $0x134] ss:$8 sps:$4 sm:$0xff]  }
  0xf4   :  { %1552 = vmatprep.subr.bf16.mxu1 %v5082_v42  ;;  %1061 = vmatprep.mubr.bf16.mxu0 %v5748_v3  ;;  %v5137_v42 = vld [vmem:[%s7620_s4 + $0xb0] ss:$8 sps:$4 sm:$0xff]  }
  0xf6   :  { %1032 = vmatpush1.bf16.msra.mxu0 %v5077_v41  ;;  %1553 = vmatpush1.bf16.msra.mxu1 %v5080_v43  ;;  %v5140_v41 = vld [vmem:[%s7620_s4 + $0x130] ss:$8 sps:$4 sm:$0xff]   ;;  %v5145_v43 = vld [vmem:[%s7620_s4 + $0xc4] ss:$8 sps:$4 sm:$0xff]  }
  0xf7   :  { %1033 = vmatprep.subr.bf16.mxu0 %v5085_v44  ;;  %1554 = vmatprep.subr.bf16.mxu1 %v5088_v46  ;;  %v5148_v44 = vld [vmem:[%s7620_s4 + $0x144] ss:$8 sps:$4 sm:$0xff]   ;;  %v5143_v46 = vld [vmem:[%s7620_s4 + $0xc0] ss:$8 sps:$4 sm:$0xff]  }
  0xf8   :  { %v403_v50 = vpop.f32.mrb[4].mxu0 }
  0xf9   :  { %v6198_v51 = vpop.f32.mrb[5].mxu0  ;;  %v6237_v4 = vpop.f32.mrb[4].mxu1  ;;  %v404_v7 = vadd.f32 %v403_v50, %v102_v63  ;;  %v5149_v50 = vld [vmem:[%s7620_s4 + $0xd0] ss:$8 sps:$4 sm:$0xff]   ;;  %v5167_v63 = vld [vmem:[%s7620_s4 + $0x180] ss:$8 sps:$4 sm:$0xff]  }
  0xfa   :  { %1034 = vmatpush1.bf16.msra.mxu0 %v5083_v45  ;;  %v407_v53 = vpop.f32.mrb[6].mxu0  ;;  %1555 = vmatpush1.bf16.msra.mxu1 %v5086_v47  ;;  %v6242_v6 = vpop.f32.mrb[5].mxu1  ;;  %v5146_v45 = vld [vmem:[%s7620_s4 + $0x140] ss:$8 sps:$4 sm:$0xff]   ;;  %v5151_v47 = vld [vmem:[%s7620_s4 + $0xd4] ss:$8 sps:$4 sm:$0xff]  }
  0xfb   :  { %1035 = vmatprep.subr.bf16.mxu0 %v5091_v48  ;;  %v408_v56 = vpop.f32.mrb[7].mxu0  ;;  %1556 = vmatprep.subr.bf16.mxu1 %v5094_v49  ;;  %v448_v14 = vpop.f32.mrb[6].mxu1  ;;  %v455_v20 = vmax.f32 %v404_v7, 0.0  ;;  %v5154_v48 = vld [vmem:[%s7620_s4 + $0x154] ss:$8 sps:$4 sm:$0xff]  }
  0xfc   :  { %v449_v16 = vpop.f32.mrb[7].mxu1  ;;  %v5152_v49 = vld [vmem:[%s7620_s4 + $0x150] ss:$8 sps:$4 sm:$0xff]   ;;  %v5160_v53 = vld [vmem:[%s7620_s4 + $0x164] ss:$8 sps:$4 sm:$0xff]  }
  0xfd   :  { %v6268_v25 = vpack.c.bf16 %v455_v20, %v455_v20  ;;  %v5163_v56 = vld [vmem:[%s7620_s4 + $0xf4] ss:$8 sps:$4 sm:$0xff]   ;;  %v5176_v7 = vld [vmem:[%s7620_s4 + $0x210] ss:$8 sps:$4 sm:$0xff]   ;;  %v5181_v14 = vld [vmem:[%s7620_s4 + $0x1a4] ss:$8 sps:$4 sm:$0xff]  }
  0xfe   :  { %1036 = vmatpush1.bf16.msra.mxu0 %v5089_v52  ;;  %1557 = vmatpush1.bf16.msra.mxu1 %v5092_v54  ;;  %v5157_v52 = vld [vmem:[%s7620_s4 + $0xe4] ss:$8 sps:$4 sm:$0xff]   ;;  %v5158_v54 = vld [vmem:[%s7620_s4 + $0x160] ss:$8 sps:$4 sm:$0xff]   ;;  %v5188_v20 = vld [vmem:[%s7620_s4 + $0x230] ss:$8 sps:$4 sm:$0xff]  }
  0xff   :  { %1037 = vmatprep.subr.bf16.mxu0 %v5097_v55  ;;  %1558 = vmatprep.subr.bf16.mxu1 %v5100_v57  ;;  %v5155_v55 = vld [vmem:[%s7620_s4 + $0xe0] ss:$8 sps:$4 sm:$0xff]   ;;  %v5166_v57 = vld [vmem:[%s7620_s4 + $0x174] ss:$8 sps:$4 sm:$0xff]  }
 0x100   :  { %v5182_v16 = vld [vmem:[%s7620_s4 + $0x220] ss:$8 sps:$4 sm:$0xff]  }
 0x102   :  { %1038 = vmatpush1.bf16.msra.mxu0 %v5095_v59  ;;  %1559 = vmatpush1.bf16.msra.mxu1 %v5098_v60  ;;  %v5164_v59 = vld [vmem:[%s7620_s4 + $0x170] ss:$8 sps:$4 sm:$0xff]  }
 0x103   :  { %1039 = vmatprep.subr.bf16.mxu0 %v5103_v61  ;;  %1560 = vmatprep.subr.bf16.mxu1 %v5106_v62  ;;  %v5161_v60 = vld [vmem:[%s7620_s4 + $0xf0] ss:$8 sps:$4 sm:$0xff]   ;;  %v5169_v61 = vld [vmem:[%s7620_s4 + $0x184] ss:$8 sps:$4 sm:$0xff]  }
 0x104   :  { %v5172_v62 = vld [vmem:[%s7620_s4 + $0x204] ss:$8 sps:$4 sm:$0xff]  }
 0x106   :  { %1040 = vmatpush1.bf16.msra.mxu0 %v5101_v0  ;;  %1561 = vmatpush1.bf16.msra.mxu1 %v5104_v1  ;;  %v5170_v0 = vld [vmem:[%s7620_s4 + $0x200] ss:$8 sps:$4 sm:$0xff]   ;;  %v5175_v1 = vld [vmem:[%s7620_s4 + $0x194] ss:$8 sps:$4 sm:$0xff]  }
 0x107   :  { %1041 = vmatprep.subr.bf16.mxu0 %v5109_v2  ;;  %1562 = vmatprep.subr.bf16.mxu1 %v5112_v5  ;;  %v5178_v2 = vld [vmem:[%s7620_s4 + $0x214] ss:$8 sps:$4 sm:$0xff]   ;;  %v5173_v5 = vld [vmem:[%s7620_s4 + $0x190] ss:$8 sps:$4 sm:$0xff]  }
 0x10a   :  { %1042 = vmatpush1.bf16.msra.mxu0 %v5107_v15  ;;  %1563 = vmatpush1.bf16.msra.mxu1 %v5110_v17  ;;  %v5184_v15 = vld [vmem:[%s7620_s4 + $0x224] ss:$8 sps:$4 sm:$0xff]   ;;  %v5187_v17 = vld [vmem:[%s7620_s4 + $0x1b4] ss:$8 sps:$4 sm:$0xff]  }
 0x10b   :  { %1043 = vmatprep.subr.bf16.mxu0 %v5115_v18  ;;  %1564 = vmatprep.subr.bf16.mxu1 %v5118_v19  ;;  %v5190_v18 = vld [vmem:[%s7620_s4 + $0x234] ss:$8 sps:$4 sm:$0xff]   ;;  %v5185_v19 = vld [vmem:[%s7620_s4 + $0x1b0] ss:$8 sps:$4 sm:$0xff]  }
 0x10e   :  { %1044 = vmatpush1.bf16.msra.mxu0 %v5113_v21  ;;  %1565 = vmatpush1.bf16.msra.mxu1 %v5116_v22  ;;  %v5193_v21 = vld [vmem:[%s7620_s4 + $0x1c4] ss:$8 sps:$4 sm:$0xff]  }
 0x10f   :  { %1591 = vmatprep.subr.bf16.mxu0 %v5124_v23  ;;  %1566 = vmatprep.subr.bf16.mxu1 %v5121_v24  ;;  %v5196_v22 = vld [vmem:[%s7620_s4 + $0x244] ss:$8 sps:$4 sm:$0xff]   ;;  %v5191_v23 = vld [vmem:[%s7620_s4 + $0x1c0] ss:$8 sps:$4 sm:$0xff]  }
 0x110   :  { %v5194_v24 = vld [vmem:[%s7620_s4 + $0x240] ss:$8 sps:$4 sm:$0xff]  }
 0x111   :  { %1062 = vmatmul.mubr.bf16.vlgmr.msra.gmra.mrb[12].mxu0 %v6268_v25 }
 0x112   :  { %1592 = vmatpush1.bf16.msra.mxu0 %v5122_v26  ;;  %1623 = vmatprep.mubr.bf16.mxu0 %v6268_v25  ;;  %v5199_v26 = vld [vmem:[%s7620_s4 + $0x1d4] ss:$8 sps:$4 sm:$0xff]  }
 0x113   :  { %1567 = vmatpush1.bf16.msra.mxu1 %v5119_v27  ;;  %1593 = vmatprep.subr.bf16.mxu0 %v5130_v28  ;;  %v105_v27 = vsub.s32 5, %v6124_v8  ;;  %v5202_v28 = vld [vmem:[%s7620_s4 + $0x254] ss:$8 sps:$4 sm:$0xff]  }
 0x114   :  { %1568 = vmatprep.subr.bf16.mxu1 %v5127_v29  ;;  %v5197_v29 = vld [vmem:[%s7620_s4 + $0x1d0] ss:$8 sps:$4 sm:$0xff]  }
 0x116   :  { %1594 = vmatpush1.bf16.msra.mxu0 %v5128_v30  ;;  %v5200_v30 = vld [vmem:[%s7620_s4 + $0x250] ss:$8 sps:$4 sm:$0xff]  }
 0x117   :  { %1569 = vmatpush1.bf16.msra.mxu1 %v5125_v31  ;;  %1595 = vmatprep.subr.bf16.mxu0 %v5136_v32  ;;  %v5205_v31 = vld [vmem:[%s7620_s4 + $0x1e4] ss:$8 sps:$4 sm:$0xff]   ;;  %v106_v32 = vrot.slane %v6129_v9, %v105_v27  ;;  %v5211_v9 = vld [vmem:[%s7620_s4 + $0x1f4] ss:$8 sps:$4 sm:$0xff]  }
 0x118   :  { %1570 = vmatprep.subr.bf16.mxu1 %v5133_v33  ;;  %v5208_v33 = vld [vmem:[%s7620_s4 + $0x264] ss:$8 sps:$4 sm:$0xff]  }
 0x11a   :  { %1596 = vmatpush1.bf16.msra.mxu0 %v5134_v34  ;;  %v5203_v34 = vld [vmem:[%s7620_s4 + $0x1e0] ss:$8 sps:$4 sm:$0xff]  }
 0x11b   :  { %1571 = vmatpush1.bf16.msra.mxu1 %v5131_v37  ;;  %1597 = vmatprep.subr.bf16.mxu0 %v5142_v40  ;;  %v5206_v37 = vld [vmem:[%s7620_s4 + $0x260] ss:$8 sps:$4 sm:$0xff]   ;;  %v5214_v40 = vld [vmem:[%s7620_s4 + $0x274] ss:$8 sps:$4 sm:$0xff]  }
 0x11c   :  { %1572 = vmatprep.subr.bf16.mxu1 %v5139_v39  ;;  %v406_v39 = vadd.f32 %v6198_v51, %v106_v32  ;;  %v5217_v51 = vld [vmem:[%s7621_s5 + $0x4] ss:$8 sps:$4 sm:$0xff]  }
 0x11d   :  { %v5277_v32 = vld [vmem:[%s7621_s5 + $0xa4] ss:$8 sps:$4 sm:$0xff]  }
 0x11e   :  { %1598 = vmatpush1.bf16.msra.mxu0 %v5140_v41  ;;  %v5209_v41 = vld [vmem:[%s7620_s4 + $0x1f0] ss:$8 sps:$4 sm:$0xff]  }
 0x11f   :  { %1573 = vmatpush1.bf16.msra.mxu1 %v5137_v42  ;;  %1599 = vmatprep.subr.bf16.mxu0 %v5148_v44  ;;  %v5212_v42 = vld [vmem:[%s7620_s4 + $0x270] ss:$8 sps:$4 sm:$0xff]   ;;  %v5220_v44 = vld [vmem:[%s7621_s5 + $0x104] ss:$8 sps:$4 sm:$0xff]  }
 0x120   :  { %1574 = vmatprep.subr.bf16.mxu1 %v5145_v43  ;;  %v456_v43 = vmax.f32 %v406_v39, 0.0  ;;  %v5281_v39 = vld [vmem:[%s7621_s5 + $0xb0] ss:$8 sps:$4 sm:$0xff]  }
 0x122   :  { %1600 = vmatpush1.bf16.msra.mxu0 %v5146_v45  ;;  %v5215_v45 = vld [vmem:[%s7621_s5] ss:$8 sps:$4 sm:$0xff]  }
 0x123   :  { %1575 = vmatpush1.bf16.msra.mxu1 %v5143_v46  ;;  %1601 = vmatprep.subr.bf16.mxu0 %v5154_v48  ;;  %v5218_v46 = vld [vmem:[%s7621_s5 + $0x100] ss:$8 sps:$4 sm:$0xff]   ;;  %v5223_v48 = vld [vmem:[%s7621_s5 + $0x14] ss:$8 sps:$4 sm:$0xff]  }
 0x124   :  { %1576 = vmatprep.subr.bf16.mxu1 %v5151_v47  ;;  %v6477_v47 = vpack.c.bf16 %v456_v43, %v456_v43  ;;  %v5292_v43 = vld [vmem:[%s7621_s5 + $0x1c4] ss:$8 sps:$4 sm:$0xff]  }
 0x126   :  { %1602 = vmatpush1.bf16.msra.mxu0 %v5152_v49  ;;  %v5226_v49 = vld [vmem:[%s7621_s5 + $0x114] ss:$8 sps:$4 sm:$0xff]  }
 0x127   :  { %1577 = vmatpush1.bf16.msra.mxu1 %v5149_v50  ;;  %1603 = vmatprep.subr.bf16.mxu0 %v5160_v53  ;;  %v5221_v50 = vld [vmem:[%s7621_s5 + $0x10] ss:$8 sps:$4 sm:$0xff]   ;;  %v5229_v53 = vld [vmem:[%s7621_s5 + $0x24] ss:$8 sps:$4 sm:$0xff]  }
 0x128   :  { %1578 = vmatprep.subr.bf16.mxu1 %v5157_v52  ;;  %v5224_v52 = vld [vmem:[%s7621_s5 + $0x110] ss:$8 sps:$4 sm:$0xff]  }
 0x12a   :  { %1604 = vmatpush1.bf16.msra.mxu0 %v5158_v54  ;;  %v5232_v54 = vld [vmem:[%s7621_s5 + $0x124] ss:$8 sps:$4 sm:$0xff]  }
 0x12b   :  { %1579 = vmatpush1.bf16.msra.mxu1 %v5155_v55  ;;  %1605 = vmatprep.subr.bf16.mxu0 %v5166_v57  ;;  %v5227_v55 = vld [vmem:[%s7621_s5 + $0x20] ss:$8 sps:$4 sm:$0xff]   ;;  %v5235_v57 = vld [vmem:[%s7621_s5 + $0x34] ss:$8 sps:$4 sm:$0xff]  }
 0x12c   :  { %1580 = vmatprep.subr.bf16.mxu1 %v5163_v56  ;;  %v5230_v56 = vld [vmem:[%s7621_s5 + $0x120] ss:$8 sps:$4 sm:$0xff]  }
 0x12e   :  { %1606 = vmatpush1.bf16.msra.mxu0 %v5164_v59  ;;  %v5238_v59 = vld [vmem:[%s7621_s5 + $0x134] ss:$8 sps:$4 sm:$0xff]  }
 0x12f   :  { %1581 = vmatpush1.bf16.msra.mxu1 %v5161_v60  ;;  %1607 = vmatprep.subr.bf16.mxu0 %v5169_v61  ;;  %v5233_v60 = vld [vmem:[%s7621_s5 + $0x30] ss:$8 sps:$4 sm:$0xff]  }
 0x130   :  { %1632 = vmatprep.subr.bf16.mxu1 %v5172_v62  ;;  %v5236_v61 = vld [vmem:[%s7621_s5 + $0x130] ss:$8 sps:$4 sm:$0xff]   ;;  %v5241_v62 = vld [vmem:[%s7621_s5 + $0x44] ss:$8 sps:$4 sm:$0xff]  }
 0x132   :  { %1583 = vmatmul.mubr.bf16.vlgmr.msra.gmra.mrb[12].mxu1 %v6156_v36  ;;  %1608 = vmatpush1.bf16.msra.mxu0 %v5167_v63  ;;  %v5179_v36 = vld [vmem:[%s7620_s4 + $0x1a0] ss:$8 sps:$4 sm:$0xff]   ;;  %v5244_v63 = vld [vmem:[%s7621_s5 + $0x144] ss:$8 sps:$4 sm:$0xff]  }
 0x133   :  { %1633 = vmatpush1.bf16.msra.mxu1 %v5170_v0  ;;  %1609 = vmatprep.subr.bf16.mxu0 %v5175_v1  ;;  %v5239_v0 = vld [vmem:[%s7621_s5 + $0x40] ss:$8 sps:$4 sm:$0xff]  }
 0x134   :  { %1634 = vmatprep.subr.bf16.mxu1 %v5178_v2  ;;  %1664 = vmatprep.mubr.bf16.mxu1 %v5748_v3  ;;  %v5242_v1 = vld [vmem:[%s7621_s5 + $0x140] ss:$8 sps:$4 sm:$0xff]   ;;  %v5247_v2 = vld [vmem:[%s7621_s5 + $0x54] ss:$8 sps:$4 sm:$0xff]  }
 0x136   :  { %1610 = vmatpush1.bf16.msra.mxu0 %v5173_v5  ;;  %v5250_v5 = vld [vmem:[%s7621_s5 + $0x154] ss:$8 sps:$4 sm:$0xff]  }
 0x137   :  { %1635 = vmatpush1.bf16.msra.mxu1 %v5176_v7  ;;  %1611 = vmatprep.subr.bf16.mxu0 %v5181_v14  ;;  %v5245_v7 = vld [vmem:[%s7621_s5 + $0x50] ss:$8 sps:$4 sm:$0xff]  }
 0x138   :  { %1636 = vmatprep.subr.bf16.mxu1 %v5184_v15  ;;  %v5248_v14 = vld [vmem:[%s7621_s5 + $0x150] ss:$8 sps:$4 sm:$0xff]   ;;  %v5256_v15 = vld [vmem:[%s7621_s5 + $0x164] ss:$8 sps:$4 sm:$0xff]  }
 0x13a   :  { %1612 = vmatpush1.bf16.msra.mxu0 %v5179_v36  ;;  %v5253_v36 = vld [vmem:[%s7621_s5 + $0x64] ss:$8 sps:$4 sm:$0xff]  }
 0x13b   :  { %1637 = vmatpush1.bf16.msra.mxu1 %v5182_v16  ;;  %1613 = vmatprep.subr.bf16.mxu0 %v5187_v17  ;;  %v5251_v16 = vld [vmem:[%s7621_s5 + $0x60] ss:$8 sps:$4 sm:$0xff]  }
 0x13c   :  { %1638 = vmatprep.subr.bf16.mxu1 %v5190_v18  ;;  %v5254_v17 = vld [vmem:[%s7621_s5 + $0x160] ss:$8 sps:$4 sm:$0xff]   ;;  %v5259_v18 = vld [vmem:[%s7621_s5 + $0x74] ss:$8 sps:$4 sm:$0xff]  }
 0x13e   :  { %1614 = vmatpush1.bf16.msra.mxu0 %v5185_v19  ;;  %v5262_v19 = vld [vmem:[%s7621_s5 + $0x174] ss:$8 sps:$4 sm:$0xff]  }
 0x13f   :  { %1639 = vmatpush1.bf16.msra.mxu1 %v5188_v20  ;;  %1615 = vmatprep.subr.bf16.mxu0 %v5193_v21  ;;  %v5257_v20 = vld [vmem:[%s7621_s5 + $0x70] ss:$8 sps:$4 sm:$0xff]  }
 0x140   :  { %1640 = vmatprep.subr.bf16.mxu1 %v5196_v22  ;;  %v5260_v21 = vld [vmem:[%s7621_s5 + $0x170] ss:$8 sps:$4 sm:$0xff]   ;;  %v5265_v22 = vld [vmem:[%s7621_s5 + $0x84] ss:$8 sps:$4 sm:$0xff]  }
 0x142   :  { %1616 = vmatpush1.bf16.msra.mxu0 %v5191_v23  ;;  %v5268_v23 = vld [vmem:[%s7621_s5 + $0x184] ss:$8 sps:$4 sm:$0xff]  }
 0x143   :  { %1641 = vmatpush1.bf16.msra.mxu1 %v5194_v24  ;;  %1617 = vmatprep.subr.bf16.mxu0 %v5199_v26  ;;  %v5263_v24 = vld [vmem:[%s7621_s5 + $0x80] ss:$8 sps:$4 sm:$0xff]  }
 0x144   :  { %1642 = vmatprep.subr.bf16.mxu1 %v5202_v28  ;;  %v5266_v26 = vld [vmem:[%s7621_s5 + $0x180] ss:$8 sps:$4 sm:$0xff]   ;;  %v5271_v28 = vld [vmem:[%s7621_s5 + $0x94] ss:$8 sps:$4 sm:$0xff]  }
 0x146   :  { %1618 = vmatpush1.bf16.msra.mxu0 %v5197_v29  ;;  %v5274_v29 = vld [vmem:[%s7621_s5 + $0x194] ss:$8 sps:$4 sm:$0xff]  }
 0x147   :  { %1643 = vmatpush1.bf16.msra.mxu1 %v5200_v30  ;;  %1619 = vmatprep.subr.bf16.mxu0 %v5205_v31  ;;  %v5269_v30 = vld [vmem:[%s7621_s5 + $0x90] ss:$8 sps:$4 sm:$0xff]  }
 0x148   :  { %1644 = vmatprep.subr.bf16.mxu1 %v5208_v33  ;;  %v5272_v31 = vld [vmem:[%s7621_s5 + $0x190] ss:$8 sps:$4 sm:$0xff]   ;;  %v5280_v33 = vld [vmem:[%s7621_s5 + $0x1a4] ss:$8 sps:$4 sm:$0xff]  }
 0x14a   :  { %1620 = vmatpush1.bf16.msra.mxu0 %v5203_v34  ;;  %v5275_v34 = vld [vmem:[%s7621_s5 + $0xa0] ss:$8 sps:$4 sm:$0xff]  }
 0x14b   :  { %1645 = vmatpush1.bf16.msra.mxu1 %v5206_v37  ;;  %1621 = vmatprep.subr.bf16.mxu0 %v5211_v9  ;;  %v5278_v37 = vld [vmem:[%s7621_s5 + $0x1a0] ss:$8 sps:$4 sm:$0xff]   ;;  %v5283_v9 = vld [vmem:[%s7621_s5 + $0xb4] ss:$8 sps:$4 sm:$0xff]  }
 0x14c   :  { %1646 = vmatprep.subr.bf16.mxu1 %v5214_v40  ;;  %v5286_v40 = vld [vmem:[%s7621_s5 + $0x1b4] ss:$8 sps:$4 sm:$0xff]  }
 0x14e   :  { %1622 = vmatpush1.bf16.msra.mxu0 %v5209_v41  ;;  %v5284_v41 = vld [vmem:[%s7621_s5 + $0x1b0] ss:$8 sps:$4 sm:$0xff]  }
 0x14f   :  { %1647 = vmatpush1.bf16.msra.mxu1 %v5212_v42  ;;  %2153 = vmatprep.subr.bf16.mxu0 %v5217_v51  ;;  %v5289_v42 = vld [vmem:[%s7621_s5 + $0xc4] ss:$8 sps:$4 sm:$0xff]   ;;  %v5287_v51 = vld [vmem:[%s7621_s5 + $0xc0] ss:$8 sps:$4 sm:$0xff]  }
 0x150   :  { %2194 = vmatprep.subr.bf16.mxu1 %v5220_v44  ;;  %v5290_v44 = vld [vmem:[%s7621_s5 + $0x1c0] ss:$8 sps:$4 sm:$0xff]  }
 0x151   :  { %1624 = vmatmul.mubr.bf16.vlgmr.msra.gmra.mrb[16].mxu0 %v6158_v38 }
 0x152   :  { %1665 = vmatmul.mubr.bf16.vlgmr.msra.gmra.mrb[16].mxu1 %v6477_v47  ;;  %2154 = vmatpush1.bf16.msra.mxu0 %v5215_v45  ;;  %v5295_v45 = vld [vmem:[%s7621_s5 + $0xd4] ss:$8 sps:$4 sm:$0xff]  }
 0x153   :  { %2185 = vmatprep.mubr.bf16.mxu0 %v6158_v38  ;;  %2195 = vmatpush1.bf16.msra.mxu1 %v5218_v46  ;;  %v5293_v46 = vld [vmem:[%s7621_s5 + $0xd0] ss:$8 sps:$4 sm:$0xff]  }
 0x154   :  { %2226 = vmatprep.mubr.bf16.mxu1 %v6477_v47  ;;  %2155 = vmatprep.subr.bf16.mxu0 %v5223_v48  ;;  %v5298_v48 = vld [vmem:[%s7621_s5 + $0x1d4] ss:$8 sps:$4 sm:$0xff]  }
 0x155   :  { %2196 = vmatprep.subr.bf16.mxu1 %v5226_v49  ;;  %v5296_v49 = vld [vmem:[%s7621_s5 + $0x1d0] ss:$8 sps:$4 sm:$0xff]  }
 0x156   :  { %2156 = vmatpush1.bf16.msra.mxu0 %v5221_v50  ;;  %v5301_v50 = vld [vmem:[%s7621_s5 + $0xe4] ss:$8 sps:$4 sm:$0xff]  }
 0x157   :  { %2197 = vmatpush1.bf16.msra.mxu1 %v5224_v52  ;;  %2157 = vmatprep.subr.bf16.mxu0 %v5229_v53  ;;  %v5304_v52 = vld [vmem:[%s7621_s5 + $0x1e4] ss:$8 sps:$4 sm:$0xff]   ;;  %v5299_v53 = vld [vmem:[%s7621_s5 + $0xe0] ss:$8 sps:$4 sm:$0xff]  }
 0x158   :  { %2198 = vmatprep.subr.bf16.mxu1 %v5232_v54  ;;  %v5302_v54 = vld [vmem:[%s7621_s5 + $0x1e0] ss:$8 sps:$4 sm:$0xff]  }
 0x15a   :  { %2158 = vmatpush1.bf16.msra.mxu0 %v5227_v55  ;;  %v5307_v55 = vld [vmem:[%s7621_s5 + $0xf4] ss:$8 sps:$4 sm:$0xff]  }
 0x15b   :  { %2199 = vmatpush1.bf16.msra.mxu1 %v5230_v56  ;;  %2159 = vmatprep.subr.bf16.mxu0 %v5235_v57  ;;  %v5310_v56 = vld [vmem:[%s7621_s5 + $0x1f4] ss:$8 sps:$4 sm:$0xff]   ;;  %v5305_v57 = vld [vmem:[%s7621_s5 + $0xf0] ss:$8 sps:$4 sm:$0xff]  }
 0x15c   :  { %2200 = vmatprep.subr.bf16.mxu1 %v5238_v59  ;;  %v5308_v59 = vld [vmem:[%s7621_s5 + $0x1f0] ss:$8 sps:$4 sm:$0xff]  }
 0x15e   :  { %2160 = vmatpush1.bf16.msra.mxu0 %v5233_v60  ;;  %v5313_v60 = vld [vmem:[%s7621_s5 + $0x204] ss:$8 sps:$4 sm:$0xff]  }
 0x15f   :  { %2201 = vmatpush1.bf16.msra.mxu1 %v5236_v61  ;;  %2161 = vmatprep.subr.bf16.mxu0 %v5241_v62  ;;  %v5311_v61 = vld [vmem:[%s7621_s5 + $0x200] ss:$8 sps:$4 sm:$0xff]   ;;  %v5316_v62 = vld [vmem:[%s7623_s6 + $0x4] ss:$8 sps:$4 sm:$0xff]  }
 0x160   :  { %2202 = vmatprep.subr.bf16.mxu1 %v5244_v63  ;;  %v5314_v63 = vld [vmem:[%s7623_s6] ss:$8 sps:$4 sm:$0xff]  }
 0x162   :  { %2162 = vmatpush1.bf16.msra.mxu0 %v5239_v0  ;;  %v5319_v0 = vld [vmem:[%s7621_s5 + $0x214] ss:$8 sps:$4 sm:$0xff]  }
 0x163   :  { %2203 = vmatpush1.bf16.msra.mxu1 %v5242_v1  ;;  %2163 = vmatprep.subr.bf16.mxu0 %v5247_v2  ;;  %v5317_v1 = vld [vmem:[%s7621_s5 + $0x210] ss:$8 sps:$4 sm:$0xff]   ;;  %v5322_v2 = vld [vmem:[%s7623_s6 + $0x14] ss:$8 sps:$4 sm:$0xff]  }
 0x164   :  { %2204 = vmatprep.subr.bf16.mxu1 %v5250_v5  ;;  %v5320_v5 = vld [vmem:[%s7623_s6 + $0x10] ss:$8 sps:$4 sm:$0xff]  }
 0x166   :  { %2164 = vmatpush1.bf16.msra.mxu0 %v5245_v7  ;;  %v5325_v7 = vld [vmem:[%s7621_s5 + $0x224] ss:$8 sps:$4 sm:$0xff]  }
 0x167   :  { %2205 = vmatpush1.bf16.msra.mxu1 %v5248_v14  ;;  %2165 = vmatprep.subr.bf16.mxu0 %v5253_v36  ;;  %v5328_v14 = vld [vmem:[%s7623_s6 + $0x24] ss:$8 sps:$4 sm:$0xff]   ;;  %v5331_v36 = vld [vmem:[%s7621_s5 + $0x234] ss:$8 sps:$4 sm:$0xff]  }
 0x168   :  { %2206 = vmatprep.subr.bf16.mxu1 %v5256_v15  ;;  %v5329_v15 = vld [vmem:[%s7621_s5 + $0x230] ss:$8 sps:$4 sm:$0xff]  }
 0x16a   :  { %2166 = vmatpush1.bf16.msra.mxu0 %v5251_v16  ;;  %v5334_v16 = vld [vmem:[%s7623_s6 + $0x34] ss:$8 sps:$4 sm:$0xff]  }
 0x16b   :  { %2207 = vmatpush1.bf16.msra.mxu1 %v5254_v17  ;;  %2167 = vmatprep.subr.bf16.mxu0 %v5259_v18  ;;  %v5332_v17 = vld [vmem:[%s7623_s6 + $0x30] ss:$8 sps:$4 sm:$0xff]   ;;  %v5337_v18 = vld [vmem:[%s7621_s5 + $0x244] ss:$8 sps:$4 sm:$0xff]  }
 0x16c   :  { %2208 = vmatprep.subr.bf16.mxu1 %v5262_v19  ;;  %v5335_v19 = vld [vmem:[%s7621_s5 + $0x240] ss:$8 sps:$4 sm:$0xff]  }
 0x16e   :  { %2168 = vmatpush1.bf16.msra.mxu0 %v5257_v20  ;;  %v5340_v20 = vld [vmem:[%s7623_s6 + $0x44] ss:$8 sps:$4 sm:$0xff]  }
 0x16f   :  { %2209 = vmatpush1.bf16.msra.mxu1 %v5260_v21  ;;  %2169 = vmatprep.subr.bf16.mxu0 %v5265_v22  ;;  %v109_v21 = vsub.s32 6, %v6124_v8  ;;  %v5338_v22 = vld [vmem:[%s7623_s6 + $0x40] ss:$8 sps:$4 sm:$0xff]  }
 0x170   :  { %2210 = vmatprep.subr.bf16.mxu1 %v5268_v23  ;;  %v5343_v23 = vld [vmem:[%s7621_s5 + $0x254] ss:$8 sps:$4 sm:$0xff]  }
 0x172   :  { %2170 = vmatpush1.bf16.msra.mxu0 %v5263_v24  ;;  %v5346_v24 = vld [vmem:[%s7623_s6 + $0x54] ss:$8 sps:$4 sm:$0xff]  }
 0x173   :  { %2211 = vmatpush1.bf16.msra.mxu1 %v5266_v26  ;;  %2171 = vmatprep.subr.bf16.mxu0 %v5271_v28  ;;  %v5341_v26 = vld [vmem:[%s7621_s5 + $0x250] ss:$8 sps:$4 sm:$0xff]   ;;  %v6740_v28 = vld [vmem:[%s7622_s2] sm:$0xff] }
 0x174   :  { %2212 = vmatprep.subr.bf16.mxu1 %v5274_v29  ;;  %v110_v29 = vrot.slane %v6740_v28, %v109_v21 }
 0x176   :  { %2172 = vmatpush1.bf16.msra.mxu0 %v5269_v30  ;;  %v5344_v30 = vld [vmem:[%s7623_s6 + $0x50] ss:$8 sps:$4 sm:$0xff]  }
 0x177   :  { %2213 = vmatpush1.bf16.msra.mxu1 %v5272_v31  ;;  %2173 = vmatprep.subr.bf16.mxu0 %v5277_v32  ;;  %v5349_v31 = vld [vmem:[%s7621_s5 + $0x264] ss:$8 sps:$4 sm:$0xff]  }
 0x178   :  { %2214 = vmatprep.subr.bf16.mxu1 %v5280_v33  ;;  %v5352_v32 = vld [vmem:[%s7623_s6 + $0x64] ss:$8 sps:$4 sm:$0xff]   ;;  %v5347_v33 = vld [vmem:[%s7621_s5 + $0x260] ss:$8 sps:$4 sm:$0xff]  }
 0x17a   :  { %2174 = vmatpush1.bf16.msra.mxu0 %v5275_v34  ;;  %v445_v34 = vadd.f32 %v6237_v4, %v110_v29  ;;  %v5353_v4 = vld [vmem:[%s7621_s5 + $0x270] ss:$8 sps:$4 sm:$0xff]   ;;  %v5406_v29 = vld [vmem:[%s7623_s6 + $0x174] ss:$8 sps:$4 sm:$0xff]  }
 0x17b   :  { %2215 = vmatpush1.bf16.msra.mxu1 %v5278_v37  ;;  %2175 = vmatprep.subr.bf16.mxu0 %v5283_v9  ;;  %v5350_v37 = vld [vmem:[%s7623_s6 + $0x60] ss:$8 sps:$4 sm:$0xff]   ;;  %v5355_v9 = vld [vmem:[%s7621_s5 + $0x274] ss:$8 sps:$4 sm:$0xff]  }
 0x17c   :  { %2216 = vmatprep.subr.bf16.mxu1 %v5286_v40  ;;  %v457_v40 = vmax.f32 %v445_v34, 0.0  ;;  %v5407_v34 = vld [vmem:[%s7623_s6 + $0x180] ss:$8 sps:$4 sm:$0xff]  }
 0x17e   :  { %2176 = vmatpush1.bf16.msra.mxu0 %v5281_v39  ;;  %v5358_v39 = vld [vmem:[%s7623_s6 + $0x74] ss:$8 sps:$4 sm:$0xff]  }
 0x17f   :  { %2217 = vmatpush1.bf16.msra.mxu1 %v5284_v41  ;;  %2177 = vmatprep.subr.bf16.mxu0 %v5289_v42  ;;  %v5356_v41 = vld [vmem:[%s7623_s6 + $0x70] ss:$8 sps:$4 sm:$0xff]   ;;  %v5364_v42 = vld [vmem:[%s7623_s6 + $0x104] ss:$8 sps:$4 sm:$0xff]  }
 0x180   :  { %2218 = vmatprep.subr.bf16.mxu1 %v5292_v43  ;;  %v5362_v43 = vld [vmem:[%s7623_s6 + $0x100] ss:$8 sps:$4 sm:$0xff]  }
 0x182   :  { %2178 = vmatpush1.bf16.msra.mxu0 %v5287_v51  ;;  %v5361_v51 = vld [vmem:[%s7623_s6 + $0x84] ss:$8 sps:$4 sm:$0xff]  }
 0x183   :  { %2219 = vmatpush1.bf16.msra.mxu1 %v5290_v44  ;;  %2179 = vmatprep.subr.bf16.mxu0 %v5295_v45  ;;  %v465_v44 = vpack.c.bf16 %v457_v40, %v457_v40  ;;  %v5359_v45 = vld [vmem:[%s7623_s6 + $0x80] ss:$8 sps:$4 sm:$0xff]   ;;  %v5418_v40 = vld [vmem:[%s7623_s6 + $0x214] ss:$8 sps:$4 sm:$0xff]  }
 0x184   :  { %2220 = vmatprep.subr.bf16.mxu1 %v5298_v48  ;;  %v5367_v48 = vld [vmem:[%s7623_s6 + $0x94] ss:$8 sps:$4 sm:$0xff]  }
 0x186   :  { %2180 = vmatpush1.bf16.msra.mxu0 %v5293_v46  ;;  %v5370_v46 = vld [vmem:[%s7623_s6 + $0x114] ss:$8 sps:$4 sm:$0xff]  }
 0x187   :  { %2221 = vmatpush1.bf16.msra.mxu1 %v5296_v49  ;;  %2181 = vmatprep.subr.bf16.mxu0 %v5301_v50  ;;  %v5365_v49 = vld [vmem:[%s7623_s6 + $0x90] ss:$8 sps:$4 sm:$0xff]  }
 0x188   :  { %2222 = vmatprep.subr.bf16.mxu1 %v5304_v52  ;;  %v5368_v50 = vld [vmem:[%s7623_s6 + $0x110] ss:$8 sps:$4 sm:$0xff]   ;;  %v5373_v52 = vld [vmem:[%s7623_s6 + $0xa4] ss:$8 sps:$4 sm:$0xff]  }
 0x18a   :  { %2182 = vmatpush1.bf16.msra.mxu0 %v5299_v53  ;;  %v5376_v53 = vld [vmem:[%s7623_s6 + $0x124] ss:$8 sps:$4 sm:$0xff]  }
 0x18b   :  { %2223 = vmatpush1.bf16.msra.mxu1 %v5302_v54  ;;  %2183 = vmatprep.subr.bf16.mxu0 %v5307_v55  ;;  %v5374_v54 = vld [vmem:[%s7623_s6 + $0x120] ss:$8 sps:$4 sm:$0xff]  }
 0x18c   :  { %2224 = vmatprep.subr.bf16.mxu1 %v5310_v56  ;;  %v5371_v55 = vld [vmem:[%s7623_s6 + $0xa0] ss:$8 sps:$4 sm:$0xff]   ;;  %v5379_v56 = vld [vmem:[%s7623_s6 + $0xb4] ss:$8 sps:$4 sm:$0xff]  }
 0x18e   :  { %2184 = vmatpush1.bf16.msra.mxu0 %v5305_v57  ;;  %v5382_v57 = vld [vmem:[%s7623_s6 + $0x134] ss:$8 sps:$4 sm:$0xff]  }
 0x18f   :  { %2225 = vmatpush1.bf16.msra.mxu1 %v5308_v59  ;;  %2235 = vmatprep.subr.bf16.mxu0 %v5313_v60  ;;  %v5380_v59 = vld [vmem:[%s7623_s6 + $0x130] ss:$8 sps:$4 sm:$0xff]  }
 0x190   :  { %2756 = vmatprep.subr.bf16.mxu1 %v5316_v62  ;;  %v5377_v60 = vld [vmem:[%s7623_s6 + $0xb0] ss:$8 sps:$4 sm:$0xff]   ;;  %v5388_v62 = vld [vmem:[%s7623_s6 + $0x144] ss:$8 sps:$4 sm:$0xff]  }
 0x191   :  { %2186 = vmatmul.mubr.bf16.vlgmr.msra.gmra.mrb[20].mxu0 %v6154_v35  ;;  %v5323_v35 = vld [vmem:[%s7621_s5 + $0x220] ss:$8 sps:$4 sm:$0xff]  }
 0x192   :  { %2227 = vmatmul.mubr.bf16.vlgmr.msra.gmra.mrb[20].mxu1 %v6268_v25  ;;  %2236 = vmatpush1.bf16.msra.mxu0 %v5311_v61  ;;  %v5385_v61 = vld [vmem:[%s7623_s6 + $0xc4] ss:$8 sps:$4 sm:$0xff]  }
 0x193   :  { %2757 = vmatpush1.bf16.msra.mxu1 %v5314_v63  ;;  %2788 = vmatprep.mubr.bf16.mxu1 %v6268_v25  ;;  %v5326_v25 = vld [vmem:[%s7623_s6 + $0x20] ss:$8 sps:$4 sm:$0xff]  }
 0x194   :  { %2237 = vmatprep.subr.bf16.mxu0 %v5319_v0  ;;  %2758 = vmatprep.subr.bf16.mxu1 %v5322_v2  ;;  %v5386_v63 = vld [vmem:[%s7623_s6 + $0x140] ss:$8 sps:$4 sm:$0xff]   ;;  %v5394_v2 = vld [vmem:[%s7623_s6 + $0x154] ss:$8 sps:$4 sm:$0xff]  }
 0x195   :  { %2267 = vmatprep.mubr.bf16.mxu0 %v5748_v3  ;;  %v5383_v0 = vld [vmem:[%s7623_s6 + $0xc0] ss:$8 sps:$4 sm:$0xff]  }
 0x196   :  { %2238 = vmatpush1.bf16.msra.mxu0 %v5317_v1  ;;  %v5391_v1 = vld [vmem:[%s7623_s6 + $0xd4] ss:$8 sps:$4 sm:$0xff]  }
 0x197   :  { %2759 = vmatpush1.bf16.msra.mxu1 %v5320_v5  ;;  %2239 = vmatprep.subr.bf16.mxu0 %v5325_v7  ;;  %v5392_v5 = vld [vmem:[%s7623_s6 + $0x150] ss:$8 sps:$4 sm:$0xff]  }
 0x198   :  { %2760 = vmatprep.subr.bf16.mxu1 %v5328_v14  ;;  %v5389_v7 = vld [vmem:[%s7623_s6 + $0xd0] ss:$8 sps:$4 sm:$0xff]   ;;  %v5400_v14 = vld [vmem:[%s7623_s6 + $0x164] ss:$8 sps:$4 sm:$0xff]  }
 0x19a   :  { %2240 = vmatpush1.bf16.msra.mxu0 %v5323_v35  ;;  %v5397_v35 = vld [vmem:[%s7623_s6 + $0xe4] ss:$8 sps:$4 sm:$0xff]  }
 0x19b   :  { %2761 = vmatpush1.bf16.msra.mxu1 %v5326_v25  ;;  %2241 = vmatprep.subr.bf16.mxu0 %v5331_v36  ;;  %v5398_v36 = vld [vmem:[%s7623_s6 + $0x160] ss:$8 sps:$4 sm:$0xff]  }
 0x19c   :  { %2762 = vmatprep.subr.bf16.mxu1 %v5334_v16 }
 0x19e   :  { %2242 = vmatpush1.bf16.msra.mxu0 %v5329_v15 }
 0x19f   :  { %2763 = vmatpush1.bf16.msra.mxu1 %v5332_v17  ;;  %2243 = vmatprep.subr.bf16.mxu0 %v5337_v18  ;;  %v5395_v17 = vld [vmem:[%s7623_s6 + $0xe0] ss:$8 sps:$4 sm:$0xff]  }
 0x1a0   :  { %2764 = vmatprep.subr.bf16.mxu1 %v5340_v20 }
 0x1a2   :  { %2244 = vmatpush1.bf16.msra.mxu0 %v5335_v19 }
 0x1a3   :  { %2765 = vmatpush1.bf16.msra.mxu1 %v5338_v22  ;;  %2245 = vmatprep.subr.bf16.mxu0 %v5343_v23 }
 0x1a4   :  { %2766 = vmatprep.subr.bf16.mxu1 %v5346_v24 }
 0x1a6   :  { %2246 = vmatpush1.bf16.msra.mxu0 %v5341_v26  ;;  %v5403_v26 = vld [vmem:[%s7623_s6 + $0xf4] ss:$8 sps:$4 sm:$0xff]  }
 0x1a7   :  { %2767 = vmatpush1.bf16.msra.mxu1 %v5344_v30  ;;  %2247 = vmatprep.subr.bf16.mxu0 %v5349_v31  ;;  %v5404_v31 = vld [vmem:[%s7623_s6 + $0x170] ss:$8 sps:$4 sm:$0xff]  }
 0x1a8   :  { %2768 = vmatprep.subr.bf16.mxu1 %v5352_v32  ;;  %v5401_v32 = vld [vmem:[%s7623_s6 + $0xf0] ss:$8 sps:$4 sm:$0xff]  }
 0x1aa   :  { %2248 = vmatpush1.bf16.msra.mxu0 %v5347_v33  ;;  %v5409_v33 = vld [vmem:[%s7623_s6 + $0x184] ss:$8 sps:$4 sm:$0xff]  }
 0x1ab   :  { %2769 = vmatpush1.bf16.msra.mxu1 %v5350_v37  ;;  %2249 = vmatprep.subr.bf16.mxu0 %v5355_v9  ;;  %v5412_v37 = vld [vmem:[%s7623_s6 + $0x204] ss:$8 sps:$4 sm:$0xff]   ;;  %v5410_v9 = vld [vmem:[%s7623_s6 + $0x200] ss:$8 sps:$4 sm:$0xff]  }
 0x1ac   :  { %2770 = vmatprep.subr.bf16.mxu1 %v5358_v39  ;;  %v5415_v39 = vld [vmem:[%s7623_s6 + $0x194] ss:$8 sps:$4 sm:$0xff]  }
 0x1ae   :  { %2250 = vmatpush1.bf16.msra.mxu0 %v5353_v4  ;;  %v5413_v4 = vld [vmem:[%s7623_s6 + $0x190] ss:$8 sps:$4 sm:$0xff]  }
 0x1af   :  { %2771 = vmatpush1.bf16.msra.mxu1 %v5356_v41  ;;  %2797 = vmatprep.subr.bf16.mxu0 %v5364_v42  ;;  %v5416_v41 = vld [vmem:[%s7623_s6 + $0x210] ss:$8 sps:$4 sm:$0xff]   ;;  %v5421_v42 = vld [vmem:[%s7623_s6 + $0x1a4] ss:$8 sps:$4 sm:$0xff]  }
 0x1b0   :  { %2772 = vmatprep.subr.bf16.mxu1 %v5361_v51  ;;  %v5419_v51 = vld [vmem:[%s7623_s6 + $0x1a0] ss:$8 sps:$4 sm:$0xff]  }
 0x1b1   :  { %2268 = vmatmul.mubr.bf16.vlgmr.msra.gmra.mrb[24].mxu0 %v465_v44 }
 0x1b2   :  { %2798 = vmatpush1.bf16.msra.mxu0 %v5362_v43  ;;  %2829 = vmatprep.mubr.bf16.mxu0 %v465_v44  ;;  %v5422_v43 = vld [vmem:[%s7623_s6 + $0x220] ss:$8 sps:$4 sm:$0xff]   ;;  %v5427_v44 = vld [vmem:[%s7623_s6 + $0x1b4] ss:$8 sps:$4 sm:$0xff]  }
 0x1b3   :  { %2773 = vmatpush1.bf16.msra.mxu1 %v5359_v45  ;;  %2799 = vmatprep.subr.bf16.mxu0 %v5370_v46  ;;  %v5425_v45 = vld [vmem:[%s7623_s6 + $0x1b0] ss:$8 sps:$4 sm:$0xff]  }
 0x1b4   :  { %2774 = vmatprep.subr.bf16.mxu1 %v5367_v48  ;;  %v5428_v46 = vld [vmem:[%s7623_s6 + $0x230] ss:$8 sps:$4 sm:$0xff]   ;;  %v5433_v48 = vld [vmem:[%s7623_s6 + $0x1c4] ss:$8 sps:$4 sm:$0xff]  }
 0x1b6   :  { %2800 = vmatpush1.bf16.msra.mxu0 %v5368_v50  ;;  %v5431_v50 = vld [vmem:[%s7623_s6 + $0x1c0] ss:$8 sps:$4 sm:$0xff]  }
 0x1b7   :  { %2775 = vmatpush1.bf16.msra.mxu1 %v5365_v49  ;;  %2801 = vmatprep.subr.bf16.mxu0 %v5376_v53  ;;  %v5436_v49 = vld [vmem:[%s7623_s6 + $0x244] ss:$8 sps:$4 sm:$0xff]   ;;  %v5439_v53 = vld [vmem:[%s7623_s6 + $0x1d4] ss:$8 sps:$4 sm:$0xff]  }
 0x1b8   :  { %2776 = vmatprep.subr.bf16.mxu1 %v5373_v52  ;;  %v5434_v52 = vld [vmem:[%s7623_s6 + $0x240] ss:$8 sps:$4 sm:$0xff]  }
 0x1ba   :  { %2802 = vmatpush1.bf16.msra.mxu0 %v5374_v54  ;;  %v113_v54 = vsub.s32 7, %v6124_v8 }
 0x1bb   :  { %2777 = vmatpush1.bf16.msra.mxu1 %v5371_v55  ;;  %2803 = vmatprep.subr.bf16.mxu0 %v5382_v57  ;;  %v5442_v55 = vld [vmem:[%s7623_s6 + $0x254] ss:$8 sps:$4 sm:$0xff]   ;;  %v5437_v57 = vld [vmem:[%s7623_s6 + $0x1d0] ss:$8 sps:$4 sm:$0xff]  }
 0x1bc   :  { %2778 = vmatprep.subr.bf16.mxu1 %v5379_v56  ;;  %v6945_v56 = vld [vmem:[%s7626_s7] sm:$0xff] }
 0x1be   :  { %2804 = vmatpush1.bf16.msra.mxu0 %v5380_v59  ;;  %v5440_v59 = vld [vmem:[%s7623_s6 + $0x250] ss:$8 sps:$4 sm:$0xff]  }
 0x1bf   :  { %2779 = vmatpush1.bf16.msra.mxu1 %v5377_v60  ;;  %2805 = vmatprep.subr.bf16.mxu0 %v5388_v62  ;;  %v5445_v60 = vld [vmem:[%s7623_s6 + $0x1e4] ss:$8 sps:$4 sm:$0xff]  }
 0x1c0   :  { %2780 = vmatprep.subr.bf16.mxu1 %v5385_v61  ;;  %v114_v61 = vrot.slane %v6740_v28, %v113_v54  ;;  %v5443_v28 = vld [vmem:[%s7623_s6 + $0x1e0] ss:$8 sps:$4 sm:$0xff]  }
 0x1c2   :  { %2806 = vmatpush1.bf16.msra.mxu0 %v5386_v63  ;;  %v5448_v63 = vld [vmem:[%s7623_s6 + $0x264] ss:$8 sps:$4 sm:$0xff]  }
 0x1c3   :  { %2781 = vmatpush1.bf16.msra.mxu1 %v5383_v0  ;;  %2807 = vmatprep.subr.bf16.mxu0 %v5394_v2  ;;  %v2888_v2 = vrot.slane %v6945_v56, %v6138_v12 }
 0x1c4   :  { %v981_v25 = vpop.f32.mrb[8].mxu0  ;;  %2782 = vmatprep.subr.bf16.mxu1 %v5391_v1  ;;  %v1022_v15 = vpop.f32.mrb[8].mxu1 }
 0x1c5   :  { %v983_v16 = vpop.f32.mrb[9].mxu0  ;;  %v6857_v18 = vadd.f32 %v1022_v15, %v981_v25  ;;  %v1024_v19 = vpop.f32.mrb[9].mxu1  ;;  %v5451_v25 = vld [vmem:[%s7623_s6 + $0x1f4] ss:$8 sps:$4 sm:$0xff]  }
 0x1c6   :  { %2808 = vmatpush1.bf16.msra.mxu0 %v5392_v5  ;;  %v985_v20 = vpop.f32.mrb[10].mxu0  ;;  %v6859_v22 = vadd.f32 %v1024_v19, %v983_v16  ;;  %v1026_v23 = vpop.f32.mrb[10].mxu1  ;;  %v5454_v15 = vld [vmem:[%s7623_s6 + $0x274] ss:$8 sps:$4 sm:$0xff]  }
 0x1c7   :  { %2783 = vmatpush1.bf16.msra.mxu1 %v5389_v7  ;;  %v986_v24 = vpop.f32.mrb[11].mxu0  ;;  %2809 = vmatprep.subr.bf16.mxu0 %v5400_v14  ;;  %v1027_v30 = vpop.f32.mrb[11].mxu1  ;;  %v5446_v14 = vld [vmem:[%s7623_s6 + $0x260] ss:$8 sps:$4 sm:$0xff]   ;;  %v5460_v20 = vld [vmem:[%s7624_s8 + $0x104] ss:$8 sps:$4 sm:$0xff]  }
 0x1c8   :  { %2784 = vmatprep.subr.bf16.mxu1 %v5397_v35  ;;  %v5455_v23 = vld [vmem:[%s7624_s8] ss:$8 sps:$4 sm:$0xff]   ;;  %v5466_v30 = vld [vmem:[%s7624_s8 + $0x114] ss:$8 sps:$4 sm:$0xff]  }
 0x1c9   :  { %v5458_v24 = vld [vmem:[%s7624_s8 + $0x100] ss:$8 sps:$4 sm:$0xff]  }
 0x1ca   :  { %2810 = vmatpush1.bf16.msra.mxu0 %v5398_v36  ;;  %v447_v36 = vadd.f32 %v6242_v6, %v114_v61  ;;  %v5457_v6 = vld [vmem:[%s7624_s8 + $0x4] ss:$8 sps:$4 sm:$0xff]   ;;  %v5502_v61 = vld [vmem:[%s7624_s8 + $0x174] ss:$8 sps:$4 sm:$0xff]  }
 0x1cb   :  { %2785 = vmatpush1.bf16.msra.mxu1 %v5395_v17  ;;  %2811 = vmatprep.subr.bf16.mxu0 %v5406_v29  ;;  %v5449_v17 = vld [vmem:[%s7623_s6 + $0x1f0] ss:$8 sps:$4 sm:$0xff]   ;;  %v5463_v29 = vld [vmem:[%s7624_s8 + $0x14] ss:$8 sps:$4 sm:$0xff]  }
 0x1cc   :  { %2786 = vmatprep.subr.bf16.mxu1 %v5403_v26  ;;  %v458_v19 = vmax.f32 %v447_v36, 0.0  ;;  %v5517_v36 = vld [vmem:[%s7624_s8 + $0xa4] ss:$8 sps:$4 sm:$0xff]  }
 0x1ce   :  { %2812 = vmatpush1.bf16.msra.mxu0 %v5404_v31  ;;  %v466_v26 = vpack.c.bf16 %v458_v19, %v458_v19  ;;  %v5521_v19 = vld [vmem:[%s7624_s8 + $0xb0] ss:$8 sps:$4 sm:$0xff]  }
 0x1cf   :  { %2787 = vmatpush1.bf16.msra.mxu1 %v5401_v32  ;;  %2813 = vmatprep.subr.bf16.mxu0 %v5409_v33  ;;  %v5461_v32 = vld [vmem:[%s7624_s8 + $0x10] ss:$8 sps:$4 sm:$0xff]  }
 0x1d0   :  { %2838 = vmatprep.subr.bf16.mxu1 %v5412_v37  ;;  %v5464_v33 = vld [vmem:[%s7624_s8 + $0x110] ss:$8 sps:$4 sm:$0xff]   ;;  %v5467_v37 = vld [vmem:[%s7624_s8 + $0x20] ss:$8 sps:$4 sm:$0xff]  }
 0x1d2   :  { %2789 = vmatmul.mubr.bf16.vlgmr.msra.gmra.mrb[24].mxu1 %v6158_v38  ;;  %2814 = vmatpush1.bf16.msra.mxu0 %v5407_v34  ;;  %v5424_v38 = vld [vmem:[%s7623_s6 + $0x224] ss:$8 sps:$4 sm:$0xff]  }
 0x1d3   :  { %2839 = vmatpush1.bf16.msra.mxu1 %v5410_v9  ;;  %2815 = vmatprep.subr.bf16.mxu0 %v5415_v39  ;;  %v5469_v34 = vld [vmem:[%s7624_s8 + $0x24] ss:$8 sps:$4 sm:$0xff]   ;;  %v5470_v9 = vld [vmem:[%s7624_s8 + $0x120] ss:$8 sps:$4 sm:$0xff]   ;;  %v5475_v39 = vld [vmem:[%s7624_s8 + $0x34] ss:$8 sps:$4 sm:$0xff]  }
 0x1d4   :  { %2840 = vmatprep.subr.bf16.mxu1 %v5418_v40  ;;  %2870 = vmatprep.mubr.bf16.mxu1 %v5748_v3  ;;  %v5430_v3 = vld [vmem:[%s7623_s6 + $0x234] ss:$8 sps:$4 sm:$0xff]   ;;  %v5473_v40 = vld [vmem:[%s7624_s8 + $0x30] ss:$8 sps:$4 sm:$0xff]  }
 0x1d6   :  { %2816 = vmatpush1.bf16.msra.mxu0 %v5413_v4  ;;  %v5478_v4 = vld [vmem:[%s7624_s8 + $0x134] ss:$8 sps:$4 sm:$0xff]  }
 0x1d7   :  { %2841 = vmatpush1.bf16.msra.mxu1 %v5416_v41  ;;  %2817 = vmatprep.subr.bf16.mxu0 %v5421_v42  ;;  %v5476_v41 = vld [vmem:[%s7624_s8 + $0x130] ss:$8 sps:$4 sm:$0xff]   ;;  %v5481_v42 = vld [vmem:[%s7624_s8 + $0x44] ss:$8 sps:$4 sm:$0xff]  }
 0x1d8   :  { %2842 = vmatprep.subr.bf16.mxu1 %v5424_v38  ;;  %v5479_v38 = vld [vmem:[%s7624_s8 + $0x40] ss:$8 sps:$4 sm:$0xff]  }
 0x1da   :  { %2818 = vmatpush1.bf16.msra.mxu0 %v5419_v51  ;;  %v5484_v51 = vld [vmem:[%s7624_s8 + $0x144] ss:$8 sps:$4 sm:$0xff]  }
 0x1db   :  { %2843 = vmatpush1.bf16.msra.mxu1 %v5422_v43  ;;  %2819 = vmatprep.subr.bf16.mxu0 %v5427_v44  ;;  %v5482_v43 = vld [vmem:[%s7624_s8 + $0x140] ss:$8 sps:$4 sm:$0xff]   ;;  %v5487_v44 = vld [vmem:[%s7624_s8 + $0x54] ss:$8 sps:$4 sm:$0xff]  }
 0x1dc   :  { %2844 = vmatprep.subr.bf16.mxu1 %v5430_v3  ;;  %v5485_v3 = vld [vmem:[%s7624_s8 + $0x50] ss:$8 sps:$4 sm:$0xff]  }
 0x1de   :  { %2820 = vmatpush1.bf16.msra.mxu0 %v5425_v45  ;;  %v5490_v45 = vld [vmem:[%s7624_s8 + $0x154] ss:$8 sps:$4 sm:$0xff]  }
 0x1df   :  { %2845 = vmatpush1.bf16.msra.mxu1 %v5428_v46  ;;  %2821 = vmatprep.subr.bf16.mxu0 %v5433_v48  ;;  %v5488_v46 = vld [vmem:[%s7624_s8 + $0x150] ss:$8 sps:$4 sm:$0xff]   ;;  %v5493_v48 = vld [vmem:[%s7624_s8 + $0x64] ss:$8 sps:$4 sm:$0xff]  }
 0x1e0   :  { %2846 = vmatprep.subr.bf16.mxu1 %v5436_v49  ;;  %v5496_v49 = vld [vmem:[%s7624_s8 + $0x164] ss:$8 sps:$4 sm:$0xff]  }
 0x1e2   :  { %2822 = vmatpush1.bf16.msra.mxu0 %v5431_v50 }
 0x1e3   :  { %2847 = vmatpush1.bf16.msra.mxu1 %v5434_v52  ;;  %2823 = vmatprep.subr.bf16.mxu0 %v5439_v53  ;;  %v5491_v53 = vld [vmem:[%s7624_s8 + $0x60] ss:$8 sps:$4 sm:$0xff]  }
 0x1e4   :  { %v1063_v62 = vpop.f32.mrb[12].mxu0  ;;  %2848 = vmatprep.subr.bf16.mxu1 %v5442_v55 }
 0x1e5   :  { %v6963_v0 = vadd.f32 %v1063_v62, %v6857_v18  ;;  %v1065_v1 = vpop.f32.mrb[13].mxu0  ;;  %v5452_v18 = vld [vmem:[%s7623_s6 + $0x270] ss:$8 sps:$4 sm:$0xff]  }
 0x1e6   :  { %v1066_v5 = vadd.f32 %v1065_v1, %v6859_v22  ;;  %v1067_v7 = vpop.f32.mrb[14].mxu0  ;;  %2824 = vmatpush1.bf16.msra.mxu0 %v5437_v57  ;;  %v5494_v57 = vld [vmem:[%s7624_s8 + $0x160] ss:$8 sps:$4 sm:$0xff]   ;;  %v5497_v62 = vld [vmem:[%s7624_s8 + $0x70] ss:$8 sps:$4 sm:$0xff]  }
 0x1e7   :  { %2849 = vmatpush1.bf16.msra.mxu1 %v5440_v59  ;;  %v1068_v35 = vpop.f32.mrb[15].mxu0  ;;  %2825 = vmatprep.subr.bf16.mxu0 %v5445_v60  ;;  %v5499_v59 = vld [vmem:[%s7624_s8 + $0x74] ss:$8 sps:$4 sm:$0xff]   ;;  %v5505_v1 = vld [vmem:[%s7624_s8 + $0x84] ss:$8 sps:$4 sm:$0xff]  }
 0x1e8   :  { %2850 = vmatprep.subr.bf16.mxu1 %v5448_v63  ;;  %v2922_v16 = vadd.f32 %v2888_v2, %v1066_v5  ;;  %v5500_v63 = vld [vmem:[%s7624_s8 + $0x170] ss:$8 sps:$4 sm:$0xff]   ;;  %v5508_v2 = vld [vmem:[%s7624_s8 + $0x184] ss:$8 sps:$4 sm:$0xff]   ;;  %v5503_v5 = vld [vmem:[%s7624_s8 + $0x80] ss:$8 sps:$4 sm:$0xff]  }
 0x1e9   :  { %v5506_v7 = vld [vmem:[%s7624_s8 + $0x180] ss:$8 sps:$4 sm:$0xff]   ;;  %v5514_v35 = vld [vmem:[%s7624_s8 + $0x194] ss:$8 sps:$4 sm:$0xff]  }
 0x1ea   :  { %2826 = vmatpush1.bf16.msra.mxu0 %v5443_v28  ;;  %v2930_v22 = vmax.f32 %v2922_v16, 0.0  ;;  %v5511_v28 = vld [vmem:[%s7624_s8 + $0x94] ss:$8 sps:$4 sm:$0xff]   ;;  %v5515_v16 = vld [vmem:[%s7624_s8 + $0xa0] ss:$8 sps:$4 sm:$0xff]  }
 0x1eb   :  { %2851 = vmatpush1.bf16.msra.mxu1 %v5446_v14  ;;  %2827 = vmatprep.subr.bf16.mxu0 %v5451_v25  ;;  %v5509_v14 = vld [vmem:[%s7624_s8 + $0x90] ss:$8 sps:$4 sm:$0xff]  }
 0x1ec   :  { %2852 = vmatprep.subr.bf16.mxu1 %v5454_v15  ;;  %v2938_v31 = vpack.c.bf16 %v2930_v22, %v2930_v22  ;;  %v5512_v25 = vld [vmem:[%s7624_s8 + $0x190] ss:$8 sps:$4 sm:$0xff]   ;;  %v5520_v15 = vld [vmem:[%s7624_s8 + $0x1a4] ss:$8 sps:$4 sm:$0xff]  }
 0x1ed   :  { %v5529_v22 = vld [vmem:[%s7624_s8 + $0xc4] ss:$8 sps:$4 sm:$0xff]  }
 0x1ee   :  { %2828 = vmatpush1.bf16.msra.mxu0 %v5449_v17  ;;  %v5518_v17 = vld [vmem:[%s7624_s8 + $0x1a0] ss:$8 sps:$4 sm:$0xff]  }
 0x1ef   :  { %2853 = vmatpush1.bf16.msra.mxu1 %v5452_v18  ;;  %3521 = vmatprep.subr.bf16.mxu0 %v5457_v6  ;;  %v5523_v18 = vld [vmem:[%s7624_s8 + $0xb4] ss:$8 sps:$4 sm:$0xff]  }
 0x1f0   :  { %3562 = vmatprep.subr.bf16.mxu1 %v5460_v20  ;;  %v5526_v6 = vld [vmem:[%s7624_s8 + $0x1b4] ss:$8 sps:$4 sm:$0xff]   ;;  %v5524_v20 = vld [vmem:[%s7624_s8 + $0x1b0] ss:$8 sps:$4 sm:$0xff]  }
 0x1f1   :  { %2830 = vmatmul.mubr.bf16.vlgmr.msra.gmra.mrb[28].mxu0 %v6477_v47  ;;  %v5472_v47 = vld [vmem:[%s7624_s8 + $0x124] ss:$8 sps:$4 sm:$0xff]  }
 0x1f2   :  { %2871 = vmatmul.mubr.bf16.vlgmr.msra.gmra.mrb[28].mxu1 %v466_v26  ;;  %3522 = vmatpush1.bf16.msra.mxu0 %v5455_v23  ;;  %v5532_v23 = vld [vmem:[%s7624_s8 + $0x1c4] ss:$8 sps:$4 sm:$0xff]   ;;  %v5530_v26 = vld [vmem:[%s7624_s8 + $0x1c0] ss:$8 sps:$4 sm:$0xff]  }
 0x1f3   :  { %3553 = vmatprep.mubr.bf16.mxu0 %v2938_v31  ;;  %3563 = vmatpush1.bf16.msra.mxu1 %v5458_v24  ;;  %v5527_v24 = vld [vmem:[%s7624_s8 + $0xc0] ss:$8 sps:$4 sm:$0xff]   ;;  %v5533_v31 = vld [vmem:[%s7624_s8 + $0xd0] ss:$8 sps:$4 sm:$0xff]  }
 0x1f4   :  { %3523 = vmatprep.subr.bf16.mxu0 %v5463_v29  ;;  %3564 = vmatprep.subr.bf16.mxu1 %v5466_v30  ;;  %v5535_v29 = vld [vmem:[%s7624_s8 + $0xd4] ss:$8 sps:$4 sm:$0xff]  }
 0x1f5   :  { %v5538_v30 = vld [vmem:[%s7624_s8 + $0x1d4] ss:$8 sps:$4 sm:$0xff]  }
 0x1f6   :  { %3524 = vmatpush1.bf16.msra.mxu0 %v5461_v32  ;;  %v2884_v32 = vrot.slane %v6945_v56, %v6132_v10 }
 0x1f7   :  { %3565 = vmatpush1.bf16.msra.mxu1 %v5464_v33  ;;  %3525 = vmatprep.subr.bf16.mxu0 %v5469_v34  ;;  %v5536_v33 = vld [vmem:[%s7624_s8 + $0x1d0] ss:$8 sps:$4 sm:$0xff]   ;;  %v5541_v34 = vld [vmem:[%s7624_s8 + $0xe4] ss:$8 sps:$4 sm:$0xff]  }
 0x1f8   :  { %3566 = vmatprep.subr.bf16.mxu1 %v5472_v47 }
 0x1fa   :  { %3526 = vmatpush1.bf16.msra.mxu0 %v5467_v37  ;;  %v5544_v37 = vld [vmem:[%s7624_s8 + $0x1e4] ss:$8 sps:$4 sm:$0xff]  }
 0x1fb   :  { %3567 = vmatpush1.bf16.msra.mxu1 %v5470_v9  ;;  %3527 = vmatprep.subr.bf16.mxu0 %v5475_v39 }
 0x1fc   :  { %3568 = vmatprep.subr.bf16.mxu1 %v5478_v4  ;;  %v2892_v4 = vrot.slane %v6945_v56, %v6135_v11 }
 0x1fe   :  { %3528 = vmatpush1.bf16.msra.mxu0 %v5473_v40 }
 0x1ff   :  { %3569 = vmatpush1.bf16.msra.mxu1 %v5476_v41  ;;  %3529 = vmatprep.subr.bf16.mxu0 %v5481_v42 }
 0x200   :  { %3570 = vmatprep.subr.bf16.mxu1 %v5484_v51  ;;  %v2896_v51 = vrot.slane %v6945_v56, %v6141_v13 }
 0x202   :  { %3530 = vmatpush1.bf16.msra.mxu0 %v5479_v38 }
 0x203   :  { %3571 = vmatpush1.bf16.msra.mxu1 %v5482_v43  ;;  %3531 = vmatprep.subr.bf16.mxu0 %v5487_v44  ;;  %v5539_v43 = vld [vmem:[%s7624_s8 + $0xe0] ss:$8 sps:$4 sm:$0xff]   ;;  %v2921_v44 = vadd.f32 %v2884_v32, %v6963_v0  ;;  %v5550_v0 = vld [vmem:[%s7624_s8 + $0x1f4] ss:$8 sps:$4 sm:$0xff]  }
 0x204   :  { %3572 = vmatprep.subr.bf16.mxu1 %v5490_v45  ;;  %v5568_v32 = vld [vmem:[%s7625_s9 + $0x54] ss:$8 sps:$4 sm:$0xff]  }
 0x205   :  { %v7066_v50 = vpop.f32.mrb[12].mxu1 }
 0x206   :  { %v7068_v52 = vpop.f32.mrb[13].mxu1  ;;  %3532 = vmatpush1.bf16.msra.mxu0 %v5485_v3 }
 0x207   :  { %v1588_v55 = vpop.f32.mrb[14].mxu1  ;;  %3573 = vmatpush1.bf16.msra.mxu1 %v5488_v46  ;;  %3533 = vmatprep.subr.bf16.mxu0 %v5493_v48  ;;  %v5542_v48 = vld [vmem:[%s7624_s8 + $0x1e0] ss:$8 sps:$4 sm:$0xff]  }
 0x208   :  { %v1589_v60 = vpop.f32.mrb[15].mxu1  ;;  %3574 = vmatprep.subr.bf16.mxu1 %v5496_v49  ;;  %v5547_v49 = vld [vmem:[%s7624_s8 + $0xf4] ss:$8 sps:$4 sm:$0xff]  }
 0x209   :  { %v5548_v60 = vld [vmem:[%s7624_s8 + $0x1f0] ss:$8 sps:$4 sm:$0xff]  }
 0x20a   :  { %3534 = vmatpush1.bf16.msra.mxu0 %v5491_v53 }
 0x20b   :  { %3575 = vmatpush1.bf16.msra.mxu1 %v5494_v57  ;;  %3535 = vmatprep.subr.bf16.mxu0 %v5499_v59  ;;  %v5545_v57 = vld [vmem:[%s7624_s8 + $0xf0] ss:$8 sps:$4 sm:$0xff]   ;;  %v2929_v59 = vmax.f32 %v2921_v44, 0.0  ;;  %v5578_v44 = vld [vmem:[%s7625_s9 + $0x80] ss:$8 sps:$4 sm:$0xff]  }
 0x20c   :  { %3576 = vmatprep.subr.bf16.mxu1 %v5502_v61  ;;  %v5577_v61 = vld [vmem:[%s7624_s8 + $0x204] ss:$8 sps:$4 sm:$0xff]  }
 0x20e   :  { %3536 = vmatpush1.bf16.msra.mxu0 %v5497_v62 }
 0x20f   :  { %3577 = vmatpush1.bf16.msra.mxu1 %v5500_v63  ;;  %3537 = vmatprep.subr.bf16.mxu0 %v5505_v1  ;;  %v5553_v1 = vld [vmem:[%s7625_s9 + $0x4] ss:$8 sps:$4 sm:$0xff]  }
 0x210   :  { %3578 = vmatprep.subr.bf16.mxu1 %v5508_v2 }
 0x212   :  { %3538 = vmatpush1.bf16.msra.mxu0 %v5503_v5  ;;  %v5575_v5 = vld [vmem:[%s7624_s8 + $0x200] ss:$8 sps:$4 sm:$0xff]  }
 0x213   :  { %3579 = vmatpush1.bf16.msra.mxu1 %v5506_v7  ;;  %3539 = vmatprep.subr.bf16.mxu0 %v5511_v28  ;;  %v2937_v7 = vpack.c.bf16 %v2929_v59, %v2929_v59  ;;  %v5551_v28 = vld [vmem:[%s7625_s9] ss:$8 sps:$4 sm:$0xff]   ;;  %v5596_v59 = vld [vmem:[%s7625_s9 + $0xb0] ss:$8 sps:$4 sm:$0xff]  }
 0x214   :  { %3580 = vmatprep.subr.bf16.mxu1 %v5514_v35 }
 0x216   :  { %3540 = vmatpush1.bf16.msra.mxu0 %v5509_v14  ;;  %v5556_v14 = vld [vmem:[%s7625_s9 + $0x14] ss:$8 sps:$4 sm:$0xff]  }
 0x217   :  { %3581 = vmatpush1.bf16.msra.mxu1 %v5512_v25  ;;  %3541 = vmatprep.subr.bf16.mxu0 %v5517_v36  ;;  %v5583_v25 = vld [vmem:[%s7624_s8 + $0x214] ss:$8 sps:$4 sm:$0xff]   ;;  %v5581_v36 = vld [vmem:[%s7624_s8 + $0x210] ss:$8 sps:$4 sm:$0xff]  }
 0x218   :  { %3582 = vmatprep.subr.bf16.mxu1 %v5520_v15  ;;  %v5554_v15 = vld [vmem:[%s7625_s9 + $0x10] ss:$8 sps:$4 sm:$0xff]  }
 0x21a   :  { %3542 = vmatpush1.bf16.msra.mxu0 %v5515_v16  ;;  %v5589_v16 = vld [vmem:[%s7624_s8 + $0x224] ss:$8 sps:$4 sm:$0xff]  }
 0x21b   :  { %3583 = vmatpush1.bf16.msra.mxu1 %v5518_v17  ;;  %3543 = vmatprep.subr.bf16.mxu0 %v5523_v18  ;;  %v5559_v17 = vld [vmem:[%s7625_s9 + $0x24] ss:$8 sps:$4 sm:$0xff]   ;;  %v5587_v18 = vld [vmem:[%s7624_s8 + $0x220] ss:$8 sps:$4 sm:$0xff]  }
 0x21c   :  { %3584 = vmatprep.subr.bf16.mxu1 %v5526_v6  ;;  %v5557_v6 = vld [vmem:[%s7625_s9 + $0x20] ss:$8 sps:$4 sm:$0xff]  }
 0x21e   :  { %3544 = vmatpush1.bf16.msra.mxu0 %v5521_v19  ;;  %v5595_v19 = vld [vmem:[%s7624_s8 + $0x234] ss:$8 sps:$4 sm:$0xff]  }
 0x21f   :  { %3585 = vmatpush1.bf16.msra.mxu1 %v5524_v20  ;;  %3545 = vmatprep.subr.bf16.mxu0 %v5529_v22  ;;  %v5562_v20 = vld [vmem:[%s7625_s9 + $0x34] ss:$8 sps:$4 sm:$0xff]   ;;  %v5593_v22 = vld [vmem:[%s7624_s8 + $0x230] ss:$8 sps:$4 sm:$0xff]  }
 0x220   :  { %3586 = vmatprep.subr.bf16.mxu1 %v5532_v23  ;;  %v5560_v23 = vld [vmem:[%s7625_s9 + $0x30] ss:$8 sps:$4 sm:$0xff]  }
 0x222   :  { %3546 = vmatpush1.bf16.msra.mxu0 %v5527_v24  ;;  %v5601_v24 = vld [vmem:[%s7624_s8 + $0x244] ss:$8 sps:$4 sm:$0xff]  }
 0x223   :  { %3587 = vmatpush1.bf16.msra.mxu1 %v5530_v26  ;;  %3547 = vmatprep.subr.bf16.mxu0 %v5535_v29  ;;  %v5565_v26 = vld [vmem:[%s7625_s9 + $0x44] ss:$8 sps:$4 sm:$0xff]   ;;  %v5599_v29 = vld [vmem:[%s7624_s8 + $0x240] ss:$8 sps:$4 sm:$0xff]  }
 0x224   :  { %v1625_v47 = vpop.f32.mrb[16].mxu0  ;;  %3588 = vmatprep.subr.bf16.mxu1 %v5538_v30  ;;  %v5563_v30 = vld [vmem:[%s7625_s9 + $0x40] ss:$8 sps:$4 sm:$0xff]  }
 0x225   :  { %v1626_v9 = vadd.f32 %v1625_v47, %v7066_v50  ;;  %v1666_v39 = vpop.f32.mrb[16].mxu1  ;;  %v1627_v40 = vpop.f32.mrb[17].mxu0  ;;  %v5613_v47 = vld [vmem:[%s7624_s8 + $0x264] ss:$8 sps:$4 sm:$0xff]  }
 0x226   :  { %v1628_v41 = vadd.f32 %v1627_v40, %v7068_v52  ;;  %v1668_v42 = vpop.f32.mrb[17].mxu1  ;;  %v1629_v38 = vpop.f32.mrb[18].mxu0  ;;  %3548 = vmatpush1.bf16.msra.mxu0 %v5533_v31  ;;  %v5607_v31 = vld [vmem:[%s7624_s8 + $0x254] ss:$8 sps:$4 sm:$0xff]  }
 0x227   :  { %v1667_v45 = vadd.f32 %v1666_v39, %v1626_v9  ;;  %v1670_v3 = vpop.f32.mrb[18].mxu1  ;;  %3589 = vmatpush1.bf16.msra.mxu1 %v5536_v33  ;;  %v1630_v46 = vpop.f32.mrb[19].mxu0  ;;  %3549 = vmatprep.subr.bf16.mxu0 %v5541_v34  ;;  %v5605_v33 = vld [vmem:[%s7624_s8 + $0x250] ss:$8 sps:$4 sm:$0xff]   ;;  %v5611_v9 = vld [vmem:[%s7624_s8 + $0x260] ss:$8 sps:$4 sm:$0xff]  }
 0x228   :  { %v1669_v50 = vadd.f32 %v1668_v42, %v1628_v41  ;;  %v1671_v52 = vpop.f32.mrb[19].mxu1  ;;  %3590 = vmatprep.subr.bf16.mxu1 %v5544_v37  ;;  %v5566_v34 = vld [vmem:[%s7625_s9 + $0x50] ss:$8 sps:$4 sm:$0xff]   ;;  %v5571_v37 = vld [vmem:[%s7625_s9 + $0x64] ss:$8 sps:$4 sm:$0xff]  }
 0x229   :  { %v2923_v53 = vadd.f32 %v2892_v4, %v1667_v45  ;;  %v5569_v39 = vld [vmem:[%s7625_s9 + $0x60] ss:$8 sps:$4 sm:$0xff]   ;;  %v5619_v4 = vld [vmem:[%s7624_s8 + $0x274] ss:$8 sps:$4 sm:$0xff]   ;;  %v5617_v41 = vld [vmem:[%s7624_s8 + $0x270] ss:$8 sps:$4 sm:$0xff]  }
 0x22a   :  { %v2924_v55 = vadd.f32 %v2896_v51, %v1669_v50  ;;  %3550 = vmatpush1.bf16.msra.mxu0 %v5539_v43  ;;  %v5574_v40 = vld [vmem:[%s7625_s9 + $0x74] ss:$8 sps:$4 sm:$0xff]   ;;  %v5572_v42 = vld [vmem:[%s7625_s9 + $0x70] ss:$8 sps:$4 sm:$0xff]   ;;  %v5625_v51 = vld [vmem:[%s7624_s8 + $0x284] ss:$8 sps:$4 sm:$0xff]  }
 0x22b   :  { %3591 = vmatpush1.bf16.msra.mxu1 %v5542_v48  ;;  %3551 = vmatprep.subr.bf16.mxu0 %v5547_v49  ;;  %v2931_v62 = vmax.f32 %v2923_v53, 0.0  ;;  %v5580_v38 = vld [vmem:[%s7625_s9 + $0x84] ss:$8 sps:$4 sm:$0xff]   ;;  %v5623_v43 = vld [vmem:[%s7624_s8 + $0x280] ss:$8 sps:$4 sm:$0xff]  }
 0x22c   :  { %v2932_v63 = vmax.f32 %v2924_v55, 0.0  ;;  %3592 = vmatprep.subr.bf16.mxu1 %v5550_v0  ;;  %v5628_v45 = vld [vmem:[%s7624_s8 + $0x294] ss:$8 sps:$4 sm:$0xff]   ;;  %v5626_v46 = vld [vmem:[%s7624_s8 + $0x290] ss:$8 sps:$4 sm:$0xff]  }
 0x22d   :  { %v7205_v35 = vpack.c.bf16 %v2931_v62, %v2931_v62  ;;  %v5586_v3 = vld [vmem:[%s7625_s9 + $0x94] ss:$8 sps:$4 sm:$0xff]   ;;  %v5584_v48 = vld [vmem:[%s7625_s9 + $0x90] ss:$8 sps:$4 sm:$0xff]   ;;  %v5631_v49 = vld [vmem:[%s7624_s8 + $0x2a4] ss:$8 sps:$4 sm:$0xff]  }
 0x22e   :  { %v2940_v2 = vpack.c.bf16 %v2932_v63, %v2932_v63  ;;  %3552 = vmatpush1.bf16.msra.mxu0 %v5545_v57  ;;  %v5592_v50 = vld [vmem:[%s7625_s9 + $0xa4] ss:$8 sps:$4 sm:$0xff]   ;;  %v5629_v52 = vld [vmem:[%s7624_s8 + $0x2a0] ss:$8 sps:$4 sm:$0xff]   ;;  %v5634_v53 = vld [vmem:[%s7624_s8 + $0x2b4] ss:$8 sps:$4 sm:$0xff]  }
 0x22f   :  { %3593 = vmatpush1.bf16.msra.mxu1 %v5548_v60  ;;  %3603 = vmatprep.subr.bf16.mxu0 %v5577_v61  ;;  %v5590_v0 = vld [vmem:[%s7625_s9 + $0xa0] ss:$8 sps:$4 sm:$0xff]   ;;  %v5598_v55 = vld [vmem:[%s7625_s9 + $0xb4] ss:$8 sps:$4 sm:$0xff]   ;;  %v5632_v57 = vld [vmem:[%s7624_s8 + $0x2b0] ss:$8 sps:$4 sm:$0xff]  }
 0x230   :  { %3594 = vmatprep.mubr.bf16.mxu1 %v2940_v2  ;;  %4220 = vmatprep.subr.bf16.mxu1 %v5553_v1  ;;  %v5637_v60 = vld [vmem:[%s7624_s8 + $0x2c4] ss:$8 sps:$4 sm:$0xff]   ;;  %v5635_v62 = vld [vmem:[%s7624_s8 + $0x2c0] ss:$8 sps:$4 sm:$0xff]   ;;  %v5640_v1 = vld [vmem:[%s7624_s8 + $0x2d4] ss:$8 sps:$4 sm:$0xff]  }
 0x231   :  { %3554 = vmatmul.mubr.bf16.vlgmr.msra.gmra.mrb[32].mxu0 %v2937_v7  ;;  %v5604_v61 = vld [vmem:[%s7625_s9 + $0xc4] ss:$8 sps:$4 sm:$0xff]   ;;  %v5602_v63 = vld [vmem:[%s7625_s9 + $0xc0] ss:$8 sps:$4 sm:$0xff]   ;;  %v5608_v7 = vld [vmem:[%s7625_s9 + $0xd0] ss:$8 sps:$4 sm:$0xff]  }
 0x232   :  { %3595 = vmatmul.mubr.bf16.vlgmr.msra.gmra.mrb[32].mxu1 %v7205_v35  ;;  %3604 = vmatpush1.bf16.msra.mxu0 %v5575_v5  ;;  %v5638_v5 = vld [vmem:[%s7624_s8 + $0x2d0] ss:$8 sps:$4 sm:$0xff]  }
 0x233   :  { %4221 = vmatpush1.bf16.msra.mxu1 %v5551_v28  ;;  %4252 = vmatprep.mubr.bf16.mxu1 %v2940_v2  ;;  %v5610_v2 = vld [vmem:[%s7625_s9 + $0xd4] ss:$8 sps:$4 sm:$0xff]   ;;  %v5643_v28 = vld [vmem:[%s7624_s8 + $0x2e4] ss:$8 sps:$4 sm:$0xff]  }
 0x234   :  { %4222 = vmatprep.subr.bf16.mxu1 %v5556_v14  ;;  %3605 = vmatprep.subr.bf16.mxu0 %v5583_v25  ;;  %v5616_v25 = vld [vmem:[%s7625_s9 + $0xe4] ss:$8 sps:$4 sm:$0xff]  }
 0x236   :  { %3606 = vmatpush1.bf16.msra.mxu0 %v5581_v36 }
 0x237   :  { %4223 = vmatpush1.bf16.msra.mxu1 %v5554_v15  ;;  %3607 = vmatprep.subr.bf16.mxu0 %v5589_v16 }
 0x238   :  { %4224 = vmatprep.subr.bf16.mxu1 %v5559_v17 }
 0x23a   :  { %3608 = vmatpush1.bf16.msra.mxu0 %v5587_v18 }
 0x23b   :  { %4225 = vmatpush1.bf16.msra.mxu1 %v5557_v6  ;;  %3609 = vmatprep.subr.bf16.mxu0 %v5595_v19  ;;  %v5641_v6 = vld [vmem:[%s7624_s8 + $0x2e0] ss:$8 sps:$4 sm:$0xff]  }
 0x23c   :  { %4226 = vmatprep.subr.bf16.mxu1 %v5562_v20 }
 0x23e   :  { %3610 = vmatpush1.bf16.msra.mxu0 %v5593_v22 }
 0x23f   :  { %4227 = vmatpush1.bf16.msra.mxu1 %v5560_v23  ;;  %3611 = vmatprep.subr.bf16.mxu0 %v5601_v24  ;;  %v5614_v23 = vld [vmem:[%s7625_s9 + $0xe0] ss:$8 sps:$4 sm:$0xff]   ;;  %v5646_v24 = vld [vmem:[%s7624_s8 + $0x2f4] ss:$8 sps:$4 sm:$0xff]  }
 0x240   :  { %4228 = vmatprep.subr.bf16.mxu1 %v5565_v26 }
 0x242   :  { %3612 = vmatpush1.bf16.msra.mxu0 %v5599_v29  ;;  %v5622_v29 = vld [vmem:[%s7625_s9 + $0xf4] ss:$8 sps:$4 sm:$0xff]  }
 0x243   :  { %4229 = vmatpush1.bf16.msra.mxu1 %v5563_v30  ;;  %3613 = vmatprep.subr.bf16.mxu0 %v5607_v31  ;;  %v5644_v30 = vld [vmem:[%s7624_s8 + $0x2f0] ss:$8 sps:$4 sm:$0xff]  }
 0x244   :  { %4230 = vmatprep.subr.bf16.mxu1 %v5568_v32  ;;  %v5620_v31 = vld [vmem:[%s7625_s9 + $0xf0] ss:$8 sps:$4 sm:$0xff]   ;;  %v5649_v32 = vld [vmem:[%s7625_s9 + $0x104] ss:$8 sps:$4 sm:$0xff]  }
 0x246   :  { %3614 = vmatpush1.bf16.msra.mxu0 %v5605_v33  ;;  %v5652_v33 = vld [vmem:[%s7625_s9 + $0x204] ss:$8 sps:$4 sm:$0xff]  }
 0x247   :  { %4231 = vmatpush1.bf16.msra.mxu1 %v5566_v34  ;;  %3615 = vmatprep.subr.bf16.mxu0 %v5613_v47  ;;  %v5650_v34 = vld [vmem:[%s7625_s9 + $0x200] ss:$8 sps:$4 sm:$0xff]   ;;  %v5658_v47 = vld [vmem:[%s7625_s9 + $0x214] ss:$8 sps:$4 sm:$0xff]  }
 0x248   :  { %4232 = vmatprep.subr.bf16.mxu1 %v5571_v37  ;;  %v5656_v37 = vld [vmem:[%s7625_s9 + $0x210] ss:$8 sps:$4 sm:$0xff]  }
 0x24a   :  { %3616 = vmatpush1.bf16.msra.mxu0 %v5611_v9  ;;  %v5664_v9 = vld [vmem:[%s7625_s9 + $0x224] ss:$8 sps:$4 sm:$0xff]  }
 0x24b   :  { %4233 = vmatpush1.bf16.msra.mxu1 %v5569_v39  ;;  %3617 = vmatprep.subr.bf16.mxu0 %v5619_v4  ;;  %v5662_v39 = vld [vmem:[%s7625_s9 + $0x220] ss:$8 sps:$4 sm:$0xff]   ;;  %v5668_v4 = vld [vmem:[%s7625_s9 + $0x230] ss:$8 sps:$4 sm:$0xff]  }
 0x24c   :  { %4234 = vmatprep.subr.bf16.mxu1 %v5574_v40  ;;  %v5676_v40 = vld [vmem:[%s7625_s9 + $0x244] ss:$8 sps:$4 sm:$0xff]  }
 0x24e   :  { %3618 = vmatpush1.bf16.msra.mxu0 %v5617_v41  ;;  %v5674_v41 = vld [vmem:[%s7625_s9 + $0x240] ss:$8 sps:$4 sm:$0xff]  }
 0x24f   :  { %4235 = vmatpush1.bf16.msra.mxu1 %v5572_v42  ;;  %3619 = vmatprep.subr.bf16.mxu0 %v5625_v51  ;;  %v5682_v42 = vld [vmem:[%s7625_s9 + $0x254] ss:$8 sps:$4 sm:$0xff]   ;;  %v2900_v51 = vrot.slane %v6945_v56, %v101_v58 }
 0x250   :  { %4236 = vmatprep.subr.bf16.mxu1 %v5580_v38  ;;  %v5680_v38 = vld [vmem:[%s7625_s9 + $0x250] ss:$8 sps:$4 sm:$0xff]  }
 0x252   :  { %3620 = vmatpush1.bf16.msra.mxu0 %v5623_v43 }
 0x253   :  { %4237 = vmatpush1.bf16.msra.mxu1 %v5578_v44  ;;  %3621 = vmatprep.subr.bf16.mxu0 %v5628_v45  ;;  %v2904_v44 = vrot.slane %v6945_v56, %v105_v27  ;;  %v5688_v45 = vld [vmem:[%s7625_s9 + $0x264] ss:$8 sps:$4 sm:$0xff]   ;;  %v5694_v27 = vld [vmem:[%s7625_s9 + $0x274] ss:$8 sps:$4 sm:$0xff]  }
 0x254   :  { %4238 = vmatprep.subr.bf16.mxu1 %v5586_v3 }
 0x256   :  { %3622 = vmatpush1.bf16.msra.mxu0 %v5626_v46 }
 0x257   :  { %4239 = vmatpush1.bf16.msra.mxu1 %v5584_v48  ;;  %3623 = vmatprep.subr.bf16.mxu0 %v5631_v49 }
 0x258   :  { %4240 = vmatprep.subr.bf16.mxu1 %v5592_v50 }
 0x25a   :  { %3624 = vmatpush1.bf16.msra.mxu0 %v5629_v52  ;;  %v5686_v52 = vld [vmem:[%s7625_s9 + $0x260] ss:$8 sps:$4 sm:$0xff]  }
 0x25b   :  { %4241 = vmatpush1.bf16.msra.mxu1 %v5590_v0  ;;  %3625 = vmatprep.subr.bf16.mxu0 %v5634_v53 }
 0x25c   :  { %4242 = vmatprep.subr.bf16.mxu1 %v5598_v55 }
 0x25e   :  { %3626 = vmatpush1.bf16.msra.mxu0 %v5632_v57  ;;  %v5692_v57 = vld [vmem:[%s7625_s9 + $0x270] ss:$8 sps:$4 sm:$0xff]  }
 0x25f   :  { %4243 = vmatpush1.bf16.msra.mxu1 %v5596_v59  ;;  %3627 = vmatprep.subr.bf16.mxu0 %v5637_v60  ;;  %v5647_v60 = vld [vmem:[%s7625_s9 + $0x100] ss:$8 sps:$4 sm:$0xff]  }
 0x260   :  { %4244 = vmatprep.subr.bf16.mxu1 %v5604_v61 }
 0x262   :  { %3628 = vmatpush1.bf16.msra.mxu0 %v5635_v62  ;;  %v5655_v62 = vld [vmem:[%s7625_s9 + $0x114] ss:$8 sps:$4 sm:$0xff]  }
 0x263   :  { %4245 = vmatpush1.bf16.msra.mxu1 %v5602_v63  ;;  %3629 = vmatprep.subr.bf16.mxu0 %v5640_v1  ;;  %v5700_v63 = vld [vmem:[%s7625_s9 + $0x284] ss:$8 sps:$4 sm:$0xff]   ;;  %v5698_v1 = vld [vmem:[%s7625_s9 + $0x280] ss:$8 sps:$4 sm:$0xff]  }
 0x264   :  { %v2187_v14 = vpop.f32.mrb[20].mxu0  ;;  %4246 = vmatprep.subr.bf16.mxu1 %v5610_v2  ;;  %v5653_v2 = vld [vmem:[%s7625_s9 + $0x110] ss:$8 sps:$4 sm:$0xff]  }
 0x265   :  { %v2228_v36 = vpop.f32.mrb[20].mxu1  ;;  %v2189_v15 = vpop.f32.mrb[21].mxu0 }
 0x266   :  { %v2229_v16 = vadd.f32 %v2228_v36, %v2187_v14  ;;  %v2230_v17 = vpop.f32.mrb[21].mxu1  ;;  %v2191_v18 = vpop.f32.mrb[22].mxu0  ;;  %3630 = vmatpush1.bf16.msra.mxu0 %v5638_v5  ;;  %v5706_v5 = vld [vmem:[%s7625_s9 + $0x294] ss:$8 sps:$4 sm:$0xff]   ;;  %v5659_v14 = vld [vmem:[%s7625_s9 + $0x120] ss:$8 sps:$4 sm:$0xff]  }
 0x267   :  { %v2231_v19 = vadd.f32 %v2230_v17, %v2189_v15  ;;  %v2232_v20 = vpop.f32.mrb[22].mxu1  ;;  %4247 = vmatpush1.bf16.msra.mxu1 %v5608_v7  ;;  %v2192_v22 = vpop.f32.mrb[23].mxu0  ;;  %3631 = vmatprep.subr.bf16.mxu0 %v5643_v28  ;;  %v5661_v7 = vld [vmem:[%s7625_s9 + $0x124] ss:$8 sps:$4 sm:$0xff]   ;;  %v5704_v28 = vld [vmem:[%s7625_s9 + $0x290] ss:$8 sps:$4 sm:$0xff]  }
 0x268   :  { %v2233_v26 = vpop.f32.mrb[23].mxu1  ;;  %4248 = vmatprep.subr.bf16.mxu1 %v5616_v25  ;;  %v5712_v25 = vld [vmem:[%s7625_s9 + $0x2a4] ss:$8 sps:$4 sm:$0xff]   ;;  %v5667_v36 = vld [vmem:[%s7625_s9 + $0x134] ss:$8 sps:$4 sm:$0xff]  }
 0x269   :  { %v5710_v15 = vld [vmem:[%s7625_s9 + $0x2a0] ss:$8 sps:$4 sm:$0xff]   ;;  %v5718_v17 = vld [vmem:[%s7625_s9 + $0x2b4] ss:$8 sps:$4 sm:$0xff]   ;;  %v5673_v18 = vld [vmem:[%s7625_s9 + $0x144] ss:$8 sps:$4 sm:$0xff]  }
 0x26a   :  { %3632 = vmatpush1.bf16.msra.mxu0 %v5641_v6  ;;  %v5716_v6 = vld [vmem:[%s7625_s9 + $0x2b0] ss:$8 sps:$4 sm:$0xff]   ;;  %v5724_v20 = vld [vmem:[%s7625_s9 + $0x2c4] ss:$8 sps:$4 sm:$0xff]   ;;  %v5679_v22 = vld [vmem:[%s7625_s9 + $0x154] ss:$8 sps:$4 sm:$0xff]  }
 0x26b   :  { %4249 = vmatpush1.bf16.msra.mxu1 %v5614_v23  ;;  %3633 = vmatprep.subr.bf16.mxu0 %v5646_v24  ;;  %v5722_v23 = vld [vmem:[%s7625_s9 + $0x2c0] ss:$8 sps:$4 sm:$0xff]   ;;  %v5677_v24 = vld [vmem:[%s7625_s9 + $0x150] ss:$8 sps:$4 sm:$0xff]   ;;  %v5730_v26 = vld [vmem:[%s7625_s9 + $0x2d4] ss:$8 sps:$4 sm:$0xff]  }
 0x26c   :  { %4250 = vmatprep.subr.bf16.mxu1 %v5622_v29  ;;  %v5685_v29 = vld [vmem:[%s7625_s9 + $0x164] ss:$8 sps:$4 sm:$0xff]  }
 0x26e   :  { %3634 = vmatpush1.bf16.msra.mxu0 %v5644_v30  ;;  %v5728_v30 = vld [vmem:[%s7625_s9 + $0x2d0] ss:$8 sps:$4 sm:$0xff]  }
 0x26f   :  { %4251 = vmatpush1.bf16.msra.mxu1 %v5620_v31  ;;  %4261 = vmatprep.subr.bf16.mxu0 %v5649_v32  ;;  %v5683_v31 = vld [vmem:[%s7625_s9 + $0x160] ss:$8 sps:$4 sm:$0xff]   ;;  %v5736_v32 = vld [vmem:[%s7625_s9 + $0x2e4] ss:$8 sps:$4 sm:$0xff]  }
 0x270   :  { %4302 = vmatprep.subr.bf16.mxu1 %v5652_v33 }
 0x272   :  { %4253 = vmatmul.mubr.bf16.vlgmr.msra.gmra.mrb[36].mxu1 %v7205_v35  ;;  %v5670_v35 = vld [vmem:[%s7625_s9 + $0x234] ss:$8 sps:$4 sm:$0xff]  }
 0x273   :  { %4303 = vmatpush1.bf16.msra.mxu1 %v5650_v34  ;;  %v5691_v34 = vld [vmem:[%s7625_s9 + $0x174] ss:$8 sps:$4 sm:$0xff]  }
 0x274   :  { %4304 = vmatprep.subr.bf16.mxu1 %v5658_v47 }
 0x277   :  { %4305 = vmatpush1.bf16.msra.mxu1 %v5656_v37 }
 0x278   :  { %4306 = vmatprep.subr.bf16.mxu1 %v5664_v9  ;;  %v5734_v9 = vld [vmem:[%s7625_s9 + $0x2e0] ss:$8 sps:$4 sm:$0xff]  }
 0x27b   :  { %4307 = vmatpush1.bf16.msra.mxu1 %v5662_v39 }
 0x27c   :  { %4308 = vmatprep.subr.bf16.mxu1 %v5670_v35  ;;  %v5689_v35 = vld [vmem:[%s7625_s9 + $0x170] ss:$8 sps:$4 sm:$0xff]  }
 0x27f   :  { %4309 = vmatpush1.bf16.msra.mxu1 %v5668_v4  ;;  %v5742_v4 = vld [vmem:[%s7625_s9 + $0x2f4] ss:$8 sps:$4 sm:$0xff]  }
 0x280   :  { %4310 = vmatprep.subr.bf16.mxu1 %v5676_v40  ;;  %v5697_v40 = vld [vmem:[%s7625_s9 + $0x184] ss:$8 sps:$4 sm:$0xff]  }
 0x283   :  { %4311 = vmatpush1.bf16.msra.mxu1 %v5674_v41  ;;  %v5740_v41 = vld [vmem:[%s7625_s9 + $0x2f0] ss:$8 sps:$4 sm:$0xff]  }
 0x284   :  { %v2269_v43 = vpop.f32.mrb[24].mxu0  ;;  %4312 = vmatprep.subr.bf16.mxu1 %v5682_v42  ;;  %v5695_v42 = vld [vmem:[%s7625_s9 + $0x180] ss:$8 sps:$4 sm:$0xff]  }
 0x285   :  { %v2270_v3 = vadd.f32 %v2269_v43, %v2229_v16  ;;  %v2271_v46 = vpop.f32.mrb[25].mxu0  ;;  %v5665_v16 = vld [vmem:[%s7625_s9 + $0x130] ss:$8 sps:$4 sm:$0xff]   ;;  %v5709_v43 = vld [vmem:[%s7625_s9 + $0x1a4] ss:$8 sps:$4 sm:$0xff]  }
 0x286   :  { %v2272_v48 = vadd.f32 %v2271_v46, %v2231_v19  ;;  %v2273_v49 = vpop.f32.mrb[26].mxu0  ;;  %v5671_v19 = vld [vmem:[%s7625_s9 + $0x140] ss:$8 sps:$4 sm:$0xff]   ;;  %v5721_v46 = vld [vmem:[%s7625_s9 + $0x1c4] ss:$8 sps:$4 sm:$0xff]  }
 0x287   :  { %v2925_v58 = vadd.f32 %v2900_v51, %v2270_v3  ;;  %v2274_v50 = vpop.f32.mrb[27].mxu0  ;;  %4313 = vmatpush1.bf16.msra.mxu1 %v5680_v38  ;;  %v5703_v51 = vld [vmem:[%s7625_s9 + $0x194] ss:$8 sps:$4 sm:$0xff]   ;;  %v5701_v38 = vld [vmem:[%s7625_s9 + $0x190] ss:$8 sps:$4 sm:$0xff]  }
 0x288   :  { %v2926_v0 = vadd.f32 %v2904_v44, %v2272_v48  ;;  %4314 = vmatprep.subr.bf16.mxu1 %v5688_v45  ;;  %v5707_v44 = vld [vmem:[%s7625_s9 + $0x1a0] ss:$8 sps:$4 sm:$0xff]   ;;  %v5715_v45 = vld [vmem:[%s7625_s9 + $0x1b4] ss:$8 sps:$4 sm:$0xff]   ;;  %v5713_v3 = vld [vmem:[%s7625_s9 + $0x1b0] ss:$8 sps:$4 sm:$0xff]  }
 0x289   :  { %v2933_v53 = vmax.f32 %v2925_v58, 0.0  ;;  %v5719_v48 = vld [vmem:[%s7625_s9 + $0x1c0] ss:$8 sps:$4 sm:$0xff]   ;;  %v5727_v49 = vld [vmem:[%s7625_s9 + $0x1d4] ss:$8 sps:$4 sm:$0xff]  }
 0x28a   :  { %v2934_v55 = vmax.f32 %v2926_v0, 0.0  ;;  %v5725_v58 = vld [vmem:[%s7625_s9 + $0x1d0] ss:$8 sps:$4 sm:$0xff]   ;;  %v5733_v50 = vld [vmem:[%s7625_s9 + $0x1e4] ss:$8 sps:$4 sm:$0xff]  }
 0x28b   :  { %4315 = vmatpush1.bf16.msra.mxu1 %v5686_v52  ;;  %v7449_v61 = vpack.c.bf16 %v2933_v53, %v2933_v53  ;;  %v5731_v0 = vld [vmem:[%s7625_s9 + $0x1e0] ss:$8 sps:$4 sm:$0xff]  }
 0x28c   :  { %v2942_v59 = vpack.c.bf16 %v2934_v55, %v2934_v55  ;;  %4316 = vmatprep.subr.bf16.mxu1 %v5694_v27  ;;  %v2908_v55 = vrot.slane %v6945_v56, %v109_v21  ;;  %v5737_v21 = vld [vmem:[%s7625_s9 + $0x1f0] ss:$8 sps:$4 sm:$0xff]  }
 0x28e   :  { %3635 = vmatprep.mubr.bf16.mxu0 %v2942_v59 }
 0x28f   :  { %3636 = vmatmul.mubr.bf16.vlgmr.msra.gmra.mrb[36].mxu0 %v7449_v61  ;;  %4317 = vmatpush1.bf16.msra.mxu1 %v5692_v57 }
 0x290   :  { %4262 = vmatpush1.bf16.msra.mxu0 %v5647_v60  ;;  %4293 = vmatprep.mubr.bf16.mxu0 %v2942_v59  ;;  %v5739_v59 = vld [vmem:[%s7625_s9 + $0x1f4] ss:$8 sps:$4 sm:$0xff]  }
 0x291   :  { %4263 = vmatprep.subr.bf16.mxu0 %v5655_v62  ;;  %4318 = vmatprep.subr.bf16.mxu1 %v5700_v63  ;;  %v2912_v63 = vrot.slane %v6945_v56, %v113_v54 }
 0x293   :  { %4319 = vmatpush1.bf16.msra.mxu1 %v5698_v1 }
 0x294   :  { %4264 = vmatpush1.bf16.msra.mxu0 %v5653_v2  ;;  %4320 = vmatprep.subr.bf16.mxu1 %v5706_v5 }
 0x295   :  { %4265 = vmatprep.subr.bf16.mxu0 %v5661_v7 }
 0x297   :  { %4321 = vmatpush1.bf16.msra.mxu1 %v5704_v28 }
 0x298   :  { %4266 = vmatpush1.bf16.msra.mxu0 %v5659_v14  ;;  %4322 = vmatprep.subr.bf16.mxu1 %v5712_v25 }
 0x299   :  { %4267 = vmatprep.subr.bf16.mxu0 %v5667_v36 }
 0x29b   :  { %4323 = vmatpush1.bf16.msra.mxu1 %v5710_v15 }
 0x29c   :  { %4268 = vmatpush1.bf16.msra.mxu0 %v5665_v16  ;;  %4324 = vmatprep.subr.bf16.mxu1 %v5718_v17 }
 0x29d   :  { %4269 = vmatprep.subr.bf16.mxu0 %v5673_v18 }
 0x29f   :  { %4325 = vmatpush1.bf16.msra.mxu1 %v5716_v6 }
 0x2a0   :  { %4270 = vmatpush1.bf16.msra.mxu0 %v5671_v19  ;;  %4326 = vmatprep.subr.bf16.mxu1 %v5724_v20 }
 0x2a1   :  { %4271 = vmatprep.subr.bf16.mxu0 %v5679_v22 }
 0x2a3   :  { %4327 = vmatpush1.bf16.msra.mxu1 %v5722_v23 }
 0x2a4   :  { %4272 = vmatpush1.bf16.msra.mxu0 %v5677_v24  ;;  %4328 = vmatprep.subr.bf16.mxu1 %v5730_v26 }
 0x2a5   :  { %v2790_v33 = vpop.f32.mrb[24].mxu1  ;;  %4273 = vmatprep.subr.bf16.mxu0 %v5685_v29  ;;  %v18_v29 = vstv %s7627_s12 }
 0x2a6   :  { %v2792_v47 = vpop.f32.mrb[25].mxu1  ;;  %19 = vst [vmem:[#allocation2] sm:$0x1] %v18_v29 }
 0x2a7   :  { %v2794_v37 = vpop.f32.mrb[26].mxu1  ;;  %4329 = vmatpush1.bf16.msra.mxu1 %v5728_v30 }
 0x2a8   :  { %v2795_v39 = vpop.f32.mrb[27].mxu1  ;;  %4274 = vmatpush1.bf16.msra.mxu0 %v5683_v31  ;;  %4330 = vmatprep.subr.bf16.mxu1 %v5736_v32  ;;  %v4373_v37 = vld [vmem:[%s7629_s11] sm:$0xf] }
 0x2a9   :  { %4275 = vmatprep.subr.bf16.mxu0 %v5691_v34 }
 0x2ab   :  { %4331 = vmatpush1.bf16.msra.mxu1 %v5734_v9 }
 0x2ac   :  { %4276 = vmatpush1.bf16.msra.mxu0 %v5689_v35  ;;  %4332 = vmatprep.subr.bf16.mxu1 %v5742_v4 }
 0x2ad   :  { %4277 = vmatprep.subr.bf16.mxu0 %v5697_v40 }
 0x2af   :  { %4333 = vmatpush1.bf16.msra.mxu1 %v5740_v41 }
 0x2b0   :  { %4278 = vmatpush1.bf16.msra.mxu0 %v5695_v42  ;;  %v4378_v42 = vrot.slane %v4373_v37, %v6132_v10 }
 0x2b1   :  { %4279 = vmatprep.subr.bf16.mxu0 %v5703_v51 }
 0x2b4   :  { %4280 = vmatpush1.bf16.msra.mxu0 %v5701_v38 }
 0x2b5   :  { %4281 = vmatprep.subr.bf16.mxu0 %v5709_v43  ;;  %v4382_v43 = vrot.slane %v4373_v37, %v6138_v12 }
 0x2b8   :  { %4282 = vmatpush1.bf16.msra.mxu0 %v5707_v44 }
 0x2b9   :  { %4283 = vmatprep.subr.bf16.mxu0 %v5715_v45 }
 0x2bc   :  { %4284 = vmatpush1.bf16.msra.mxu0 %v5713_v3 }
 0x2bd   :  { %4285 = vmatprep.subr.bf16.mxu0 %v5721_v46 }
 0x2c0   :  { %4286 = vmatpush1.bf16.msra.mxu0 %v5719_v48 }
 0x2c1   :  { %4287 = vmatprep.subr.bf16.mxu0 %v5727_v49 }
 0x2c4   :  { %4288 = vmatpush1.bf16.msra.mxu0 %v5725_v58  ;;  %v2831_v52 = vpop.f32.mrb[28].mxu0 }
 0x2c5   :  { %v2832_v27 = vadd.f32 %v2831_v52, %v2790_v33  ;;  %v2872_v53 = vpop.f32.mrb[28].mxu1  ;;  %v2833_v57 = vpop.f32.mrb[29].mxu0  ;;  %4289 = vmatprep.subr.bf16.mxu0 %v5733_v50  ;;  %v4343_v33 = vld [vmem:[%s7628_s10] sm:$0xf] }
 0x2c6   :  { %v2834_v60 = vadd.f32 %v2833_v57, %v2792_v47  ;;  %v2874_v62 = vpop.f32.mrb[29].mxu1  ;;  %v2835_v1 = vpop.f32.mrb[30].mxu0  ;;  %v4348_v34 = vrot.slane %v4343_v33, %v6132_v10  ;;  %v4352_v9 = vrot.slane %v4343_v33, %v6138_v12  ;;  %v4356_v52 = vrot.slane %v4343_v33, %v6135_v11 }
 0x2c7   :  { %v2873_v2 = vadd.f32 %v2872_v53, %v2832_v27  ;;  %v2876_v5 = vpop.f32.mrb[30].mxu1  ;;  %v2836_v7 = vpop.f32.mrb[31].mxu0  ;;  %v4386_v1 = vrot.slane %v4373_v37, %v6135_v11 }
 0x2c8   :  { %v2875_v28 = vadd.f32 %v2874_v62, %v2834_v60  ;;  %v2877_v14 = vpop.f32.mrb[31].mxu1  ;;  %4290 = vmatpush1.bf16.msra.mxu0 %v5731_v0  ;;  %v4390_v5 = vrot.slane %v4373_v37, %v6141_v13 }
 0x2c9   :  { %v2927_v25 = vadd.f32 %v2908_v55, %v2873_v2  ;;  %4291 = vmatprep.subr.bf16.mxu0 %v5739_v59  ;;  %v4360_v55 = vrot.slane %v4343_v33, %v6141_v13 }
 0x2ca   :  { %v2928_v36 = vadd.f32 %v2912_v63, %v2875_v28 }
 0x2cb   :  { %v2935_v15 = vmax.f32 %v2927_v25, 0.0 }
 0x2cc   :  { %v2936_v16 = vmax.f32 %v2928_v36, 0.0  ;;  %4292 = vmatpush1.bf16.msra.mxu0 %v5737_v21 }
 0x2cd   :  { %v2943_v17 = vpack.c.bf16 %v2935_v15, %v2935_v15  ;;  %v4972_v15 = vld [vmem:[#allocation2] ss:$0 sm:$0xff] }
 0x2ce   :  { %v2944_v8 = vpack.c.bf16 %v2936_v16, %v2936_v16 }
 0x2cf   :  { %4294 = vmatmul.mubr.bf16.vlgmr.msra.gmra.mrb[40].mxu0 %v7449_v61 }
 0x2d0   :  { %4334 = vmatprep.mubr.bf16.mxu1 %v2944_v8 }
 0x2d1   :  { %4335 = vmatmul.mubr.bf16.vlgmr.msra.gmra.mrb[40].mxu1 %v2943_v17 }
 0x304   :  { %v3555_v54 = vpop.f32.mrb[32].mxu0 }
 0x305   :  { %v3596_v56 = vpop.f32.mrb[32].mxu1  ;;  %v3557_v18 = vpop.f32.mrb[33].mxu0 }
 0x306   :  { %v3597_v6 = vadd.f32 %v3596_v56, %v3555_v54  ;;  %v3598_v19 = vpop.f32.mrb[33].mxu1  ;;  %v3559_v20 = vpop.f32.mrb[34].mxu0 }
 0x307   :  { %v3599_v22 = vadd.f32 %v3598_v19, %v3557_v18  ;;  %v3600_v23 = vpop.f32.mrb[34].mxu1  ;;  %v3560_v24 = vpop.f32.mrb[35].mxu0 }
 0x308   :  { %v3601_v26 = vpop.f32.mrb[35].mxu1 }
 0x345   :  { %v4254_v30 = vpop.f32.mrb[36].mxu1 }
 0x346   :  { %v4256_v31 = vpop.f32.mrb[37].mxu1 }
 0x347   :  { %v4258_v61 = vpop.f32.mrb[38].mxu1 }
 0x348   :  { %v4259_v32 = vpop.f32.mrb[39].mxu1 }
 0x362   :  { %v3637_v47 = vpop.f32.mrb[36].mxu0 }
 0x363   :  { %v3638_v39 = vadd.f32 %v3637_v47, %v3597_v6  ;;  %v3639_v35 = vpop.f32.mrb[37].mxu0 }
 0x364   :  { %v3640_v4 = vadd.f32 %v3639_v35, %v3599_v22  ;;  %v3641_v40 = vpop.f32.mrb[38].mxu0 }
 0x365   :  { %v4365_v41 = vadd.f32 %v4348_v34, %v3638_v39  ;;  %v3642_v51 = vpop.f32.mrb[39].mxu0 }
 0x366   :  { %v4366_v38 = vadd.f32 %v4352_v9, %v3640_v4 }
 0x367   :  { %v4369_v44 = vmax.f32 %v4365_v41, 0.0 }
 0x368   :  { %v4370_v45 = vmax.f32 %v4366_v38, 0.0 }
 0x369   :  { %v4395_v3 = vmul.f32 %v4378_v42, %v4369_v44 }
 0x36a   :  { %v4396_v46 = vmul.f32 %v4382_v43, %v4370_v45 }
 0x36c   :  { %v4399_v48 = vadd.f32 %v4396_v46, %v4395_v3 }
 0x3a2   :  { %v4295_v49 = vpop.f32.mrb[40].mxu0 }
 0x3a3   :  { %v4296_v58 = vadd.f32 %v4295_v49, %v4254_v30  ;;  %v4297_v50 = vpop.f32.mrb[41].mxu0 }
 0x3a4   :  { %v4298_v0 = vadd.f32 %v4297_v50, %v4256_v31  ;;  %v4299_v27 = vpop.f32.mrb[42].mxu0  ;;  %v4336_v53 = vpop.f32.mrb[40].mxu1 }
 0x3a5   :  { %v4300_v10 = vpop.f32.mrb[43].mxu0  ;;  %v4337_v57 = vadd.f32 %v4336_v53, %v4296_v58  ;;  %v4338_v59 = vpop.f32.mrb[41].mxu1 }
 0x3a6   :  { %v4339_v60 = vadd.f32 %v4338_v59, %v4298_v0  ;;  %v4340_v12 = vpop.f32.mrb[42].mxu1 }
 0x3a7   :  { %v4367_v62 = vadd.f32 %v4356_v52, %v4337_v57  ;;  %v4341_v63 = vpop.f32.mrb[43].mxu1 }
 0x3a8   :  { %v4368_v2 = vadd.f32 %v4360_v55, %v4339_v60 }
 0x3a9   :  { %v4371_v7 = vmax.f32 %v4367_v62, 0.0 }
 0x3aa   :  { %v4372_v28 = vmax.f32 %v4368_v2, 0.0 }
 0x3ab   :  { %v4397_v14 = vmul.f32 %v4386_v1, %v4371_v7 }
 0x3ac   :  { %v4398_v21 = vmul.f32 %v4390_v5, %v4372_v28 }
 0x3ad   :  { %v4400_v25 = vadd.f32 %v4399_v48, %v4397_v14 }
 0x3af   :  { %v4401_v36 = vadd.f32 %v4400_v25, %v4398_v21 }
 0x3b1   :  { %4402 = vadd.xlane.f32.xlu0 %v4401_v36 }
 0x43e   :  { %v4403_v16 = vpop.xlane.xlu0 %4402 }
 0x43f   :  { %v4411_v8 = vadd.f32 %v4972_v15, %v4403_v16 }
 0x441   :  { %v4973_v17 = vmul.f32 -1.442695, %v4411_v8 }
 0x443   :  { %5743 = vpow2.f32 %v4973_v17 }
 0x44d   :  { %v5744_v54 = vpop.eup %5743 }
 0x44e   :  { %v4415_v56 = vadd.f32 1.0, %v5744_v54 }
 0x450   :  { %5745 = vrcp.f32 %v4415_v56 }
 0x45a   :  { %v5746_v11 = vpop.eup %5745 }
 0x45b   :  { %4419 = vst.msk [vmem:[%s7630_s13] sm:$0xff] %vm4418_vm1, %v5746_v11 }

</bundles_post_ra>
